<compile_context>
chip_gen: v7x
topology: tpu7x:2x2x1
jax: 0.10.0
libtpu: 0.0.40
codegen_flags: <defaults>
</compile_context>

<pallas_src>
import numpy as np
import jax
import jax.numpy as jnp
from jax.experimental import pallas as pl
from jax.experimental.pallas import tpu as pltpu

LEAKY_SLOPE = 0.01  # torch.nn.functional.leaky_relu default
NORM_EPS = 1e-12


def _leaky(x):
    return jnp.where(x > 0, x, LEAKY_SLOPE * x)


def _round_up(x, m):
    return (x + m - 1) // m * m


# ------------------------------ Pallas kernel -------------------------------

def conv_kernel(nodeset_h_ref, neighbor_h_ref, nbw_ref,
                qw_ref, qb_ref, wn_ref, wa_ref, wb_ref, out_ref):
    """One row-tile of a PinSage ConvLayer.

    nodeset_h_ref : (tile_n, in_dim)       bf16
    neighbor_h_ref: (T, tile_n, in_dim)    bf16
    nbw_ref       : (T, tile_n, 1)         f32, pre-normalized neighbor weights
    qw_ref        : (in_dim, hidden_pad)   bf16    qb_ref: (1, hidden_pad) f32
    wn_ref        : (in_dim, out_pad)      bf16    (W on the nodeset_h half)
    wa_ref        : (hidden_pad, out_pad)  bf16    (W on the agg half)
    wb_ref        : (1, out_pad)           f32
    out_ref       : (tile_n, out_pad)      f32, lane-dense
    """
    T, tile_n, in_dim = neighbor_h_ref.shape
    hidden_p = qw_ref.shape[1]

    # --- Q-linear + leaky_relu on ALL T hops in ONE MXU pass -----------------
    nb_flat = neighbor_h_ref[...].reshape(T * tile_n, in_dim)
    q = jnp.dot(nb_flat, qw_ref[...], preferred_element_type=jnp.float32)
    q = _leaky(q + qb_ref[...])
    q = q.reshape(T, tile_n, hidden_p)

    # --- weighted aggregation (weights already normalized) -------------------
    agg = jnp.sum(nbw_ref[...] * q, axis=0)                  # (tile_n, hidden_p) f32

    # --- W on concat([nodeset_h, agg]) == nodeset_h @ Wn + agg @ Wa ----------
    new_h = (jnp.dot(nodeset_h_ref[...], wn_ref[...],
                     preferred_element_type=jnp.float32)
             + jnp.dot(agg.astype(wa_ref.dtype), wa_ref[...],
                       preferred_element_type=jnp.float32)
             + wb_ref[...])
    new_h = _leaky(new_h)

    # --- L2 normalize (padded output columns are exact zeros) ----------------
    ssq = jnp.sum(new_h * new_h, axis=1, keepdims=True)
    out_ref[...] = new_h * jax.lax.rsqrt(ssq + NORM_EPS)


# ------------------------------ wrapper --------------------------------------

def conv_layer_forward(h, nodeset, nb_nodes, nb_weights, params, *, tile_n=128):
    """Pallas ConvLayer forward. Returns (n_nodes, out_dim) float32."""
    in_dim = params["in_dim"]
    out_dim = params["out_dim"]
    hidden_pad = params["Qw"].shape[1]
    out_pad = params["Wn"].shape[1]

    n, T = nb_nodes.shape

    # Embedding gathers stay in XLA (dynamic index gather, pure glue).
    # TODO(synk): for a fully fused multi-layer model, scalar-prefetch the indices
    # and DMA-gather rows from an HBM-resident table inside the kernel.
    nodeset_h = jnp.take(h, nodeset, axis=0)[:, :in_dim]                 # (n, in_dim)
    neighbor_h = jnp.take(h, nb_nodes.T.reshape(-1), axis=0)[:, :in_dim]
    neighbor_h = neighbor_h.reshape(T, n, in_dim)                        # (T, n, in_dim)

    # Pre-normalize neighbor weights so the kernel needs no reduce/divide.
    w_norm = nb_weights / jnp.sum(nb_weights, axis=1, keepdims=True)     # (n, T)
    w_norm = jnp.transpose(w_norm)[:, :, None].astype(jnp.float32)       # (T, n, 1)

    # Row padding: tile_n multiple of 16 (bf16 sublane packing), n padded to tile_n.
    tile_n = max(16, min(tile_n, _round_up(n, 16)))
    tile_n = _round_up(tile_n, 16)
    n_pad_total = _round_up(n, tile_n)
    pad_n = n_pad_total - n

    nodeset_h_p = jnp.pad(nodeset_h, ((0, pad_n), (0, 0))).astype(jnp.bfloat16)
    neighbor_h_p = jnp.pad(neighbor_h, ((0, 0), (0, pad_n), (0, 0))).astype(jnp.bfloat16)
    w_norm_p = jnp.pad(w_norm, ((0, 0), (0, pad_n), (0, 0)))

    grid = (n_pad_total // tile_n,)

    out = pl.pallas_call(
        conv_kernel,
        out_shape=jax.ShapeDtypeStruct((n_pad_total, out_pad), jnp.float32),
        grid_spec=pltpu.PrefetchScalarGridSpec(
            num_scalar_prefetch=0,
            grid=grid,
            in_specs=[
                pl.BlockSpec((tile_n, in_dim), lambda i: (i, 0)),        # nodeset_h
                pl.BlockSpec((T, tile_n, in_dim), lambda i: (0, i, 0)),  # neighbor_h
                pl.BlockSpec((T, tile_n, 1), lambda i: (0, i, 0)),       # norm. weights
                pl.BlockSpec((in_dim, hidden_pad), lambda i: (0, 0)),    # Qw
                pl.BlockSpec((1, hidden_pad), lambda i: (0, 0)),         # Qb
                pl.BlockSpec((in_dim, out_pad), lambda i: (0, 0)),       # Wn
                pl.BlockSpec((hidden_pad, out_pad), lambda i: (0, 0)),   # Wa
                pl.BlockSpec((1, out_pad), lambda i: (0, 0)),            # Wb
            ],
            out_specs=pl.BlockSpec((tile_n, out_pad), lambda i: (i, 0)),
        ),
        compiler_params=pltpu.CompilerParams(
            dimension_semantics=("parallel",)),   # v7x: split row tiles over 2 TCs
    )(nodeset_h_p, neighbor_h_p, w_norm_p,
      params["Qw"], params["Qb"], params["Wn"], params["Wa"], params["Wb"])

    return out[:n, :out_dim]


# ------------------------------ params & reference ---------------------------

def xavier_uniform(key, fan_in, fan_out, shape):
    bound = float(np.sqrt(6.0 / (fan_in + fan_out)))
    return jax.random.uniform(key, shape, jnp.float32, -bound, bound)


def init_conv_params(key, in_dim, hidden_dim, out_dim):
    kq, kw = jax.random.split(key)
    # f32 "torch" weights, pre-transposed to (in_features, out_features).
    Qw_f32 = xavier_uniform(kq, in_dim, hidden_dim, (in_dim, hidden_dim))
    Qb_f32 = jnp.full((1, hidden_dim), 0.3, jnp.float32)
    W_f32 = xavier_uniform(kw, in_dim + hidden_dim, out_dim,
                           (in_dim + hidden_dim, out_dim))
    Wb_f32 = jnp.full((1, out_dim), 0.3, jnp.float32)

    # Kernel-side weights: lane-pad hidden/out to 128, split W into Wn/Wa, bf16 cast.
    hidden_pad = _round_up(hidden_dim, 128)
    out_pad = _round_up(out_dim, 128)
    Qw = jnp.zeros((in_dim, hidden_pad), jnp.float32).at[:, :hidden_dim].set(Qw_f32)
    Qb = jnp.zeros((1, hidden_pad), jnp.float32).at[:, :hidden_dim].set(Qb_f32)
    Wn = jnp.zeros((in_dim, out_pad), jnp.float32).at[:, :out_dim].set(W_f32[:in_dim])
    Wa = jnp.zeros((hidden_pad, out_pad), jnp.float32).at[:hidden_dim, :out_dim].set(
        W_f32[in_dim:])
    Wb = jnp.zeros((1, out_pad), jnp.float32).at[:, :out_dim].set(Wb_f32)

    return dict(
        in_dim=in_dim, hidden_dim=hidden_dim, out_dim=out_dim,
        Qw_f32=Qw_f32, Qb_f32=Qb_f32, W_f32=W_f32, Wb_f32=Wb_f32,
        Qw=Qw.astype(jnp.bfloat16), Qb=Qb,
        Wn=Wn.astype(jnp.bfloat16), Wa=Wa.astype(jnp.bfloat16), Wb=Wb,
    )


def conv_layer_ref(h, nodeset, nb_nodes, nb_weights, params):
    """Pure-JAX f32 reference mirroring torch ConvLayer.forward exactly."""
    in_dim = params["in_dim"]
    n, T = nb_nodes.shape
    nodeset_h = h[nodeset, :in_dim]
    neighbor_h = h[nb_nodes.reshape(-1), :in_dim].reshape(n, T, in_dim)
    q = _leaky(jnp.einsum("ntd,dh->nth", neighbor_h, params["Qw_f32"])
               + params["Qb_f32"])
    agg = (nb_weights[:, :, None] * q).sum(1) / nb_weights.sum(1, keepdims=True)
    concat = jnp.concatenate([nodeset_h, agg], axis=1)
    new_h = _leaky(concat @ params["W_f32"] + params["Wb_f32"])
    return new_h / jnp.linalg.norm(new_h, axis=1, keepdims=True)


# ----------------------------------- main ------------------------------------

if __name__ == "__main__":
    n_items, in_dim, hidden_dim, out_dim, T = 256, 32, 24, 16, 3
    n_nodes = 200

    key = jax.random.PRNGKey(0)
    k_h, k_ns, k_nb, k_w, k_p = jax.random.split(key, 5)

    h = jax.random.normal(k_h, (n_items, in_dim), jnp.float32)
    nodeset = jax.random.permutation(k_ns, n_items)[:n_nodes].astype(jnp.int32)
    nb_nodes = jax.random.randint(k_nb, (n_nodes, T), 0, n_items, jnp.int32)
    nb_weights = jax.random.uniform(k_w, (n_nodes, T), jnp.float32, 0.1, 1.0)

    params = init_conv_params(k_p, in_dim, hidden_dim, out_dim)

    out = conv_layer_forward(h, nodeset, nb_nodes, nb_weights, params, tile_n=128)
    out = jax.block_until_ready(out)

    out_ref = jax.block_until_ready(
        conv_layer_ref(h, nodeset, nb_nodes, nb_weights, params))

    assert out.shape == (n_nodes, out_dim)
    # bf16 MXU operands vs. the f32 reference -> ~1e-3 abs error on unit-norm rows.
    np.testing.assert_allclose(np.asarray(out), np.asarray(out_ref),
                               rtol=2e-2, atol=2e-2)
    print("KERNEL_OK")
</pallas_src>

<mosaic_0001>
module attributes {stable_mosaic.version = 11 : i64} {
  func.func @conv_kernel(%arg0: i32, %arg1: memref<128x32xbf16, #tpu.memory_space<vmem>>, %arg2: memref<3x128x32xbf16, #tpu.memory_space<vmem>>, %arg3: memref<3x128x1xf32, #tpu.memory_space<vmem>>, %arg4: memref<32x128xbf16, #tpu.memory_space<vmem>>, %arg5: memref<1x128xf32, #tpu.memory_space<vmem>>, %arg6: memref<32x128xbf16, #tpu.memory_space<vmem>>, %arg7: memref<128x128xbf16, #tpu.memory_space<vmem>>, %arg8: memref<1x128xf32, #tpu.memory_space<vmem>>, %arg9: memref<128x128xf32, #tpu.memory_space<vmem>>) attributes {dimension_semantics = [#tpu.dimension_semantics<parallel>], iteration_bounds = array<i64: 2>, scalar_prefetch = 0 : i64, scratch_operands = 0 : i64, tpu.core_type = #tpu.core_type<tc>, window_params = [{transform_indices = @transform_0, window_bounds = array<i64: 128, 32>}, {transform_indices = @transform_1, window_bounds = array<i64: 3, 128, 32>}, {transform_indices = @transform_2, window_bounds = array<i64: 3, 128, 1>}, {pipeline_mode = #tpu.pipeline_mode<synchronous>, transform_indices = @transform_3, window_bounds = array<i64: 32, 128>}, {pipeline_mode = #tpu.pipeline_mode<synchronous>, transform_indices = @transform_4, window_bounds = array<i64: 1, 128>}, {pipeline_mode = #tpu.pipeline_mode<synchronous>, transform_indices = @transform_5, window_bounds = array<i64: 32, 128>}, {pipeline_mode = #tpu.pipeline_mode<synchronous>, transform_indices = @transform_6, window_bounds = array<i64: 128, 128>}, {pipeline_mode = #tpu.pipeline_mode<synchronous>, transform_indices = @transform_7, window_bounds = array<i64: 1, 128>}, {transform_indices = @transform_8, window_bounds = array<i64: 128, 128>}]} {
    %c0 = arith.constant 0 : index
    %c0_0 = arith.constant 0 : index
    %c0_1 = arith.constant 0 : index
    %0 = vector.load %arg2[%c0, %c0_0, %c0_1] : memref<3x128x32xbf16, #tpu.memory_space<vmem>>, vector<3x128x32xbf16>
    %1 = vector.shape_cast %0 : vector<3x128x32xbf16> to vector<384x32xbf16>
    %c0_2 = arith.constant 0 : index
    %c0_3 = arith.constant 0 : index
    %2 = vector.load %arg4[%c0_2, %c0_3] : memref<32x128xbf16, #tpu.memory_space<vmem>>, vector<32x128xbf16>
    %cst = arith.constant dense<0.000000e+00> : vector<384x128xf32>
    %3 = tpu.matmul %1, %2, %cst {dimension_numbers = #tpu.dot_dimension_numbers<[1], [0], [0], [1], [0, 0, 1, 1], [], []>} : vector<384x32xbf16>, vector<32x128xbf16>, vector<384x128xf32> -> vector<384x128xf32>
    %c0_4 = arith.constant 0 : index
    %c0_5 = arith.constant 0 : index
    %4 = vector.load %arg5[%c0_4, %c0_5] : memref<1x128xf32, #tpu.memory_space<vmem>>, vector<1x128xf32>
    %5 = vector.broadcast %4 : vector<1x128xf32> to vector<384x128xf32>
    %6 = arith.addf %3, %5 : vector<384x128xf32>
    %cst_6 = arith.constant 0.000000e+00 : f32
    %7 = vector.broadcast %cst_6 : f32 to vector<384x128xf32>
    %8 = arith.cmpf ogt, %6, %7 : vector<384x128xf32>
    %cst_7 = arith.constant 0.00999999977 : f32
    %9 = vector.broadcast %cst_7 : f32 to vector<384x128xf32>
    %10 = arith.mulf %9, %6 : vector<384x128xf32>
    %11 = arith.select %8, %6, %10 : vector<384x128xi1>, vector<384x128xf32>
    %12 = vector.shape_cast %11 : vector<384x128xf32> to vector<3x128x128xf32>
    %c0_8 = arith.constant 0 : index
    %c0_9 = arith.constant 0 : index
    %c0_10 = arith.constant 0 : index
    %13 = vector.load %arg3[%c0_8, %c0_9, %c0_10] : memref<3x128x1xf32, #tpu.memory_space<vmem>>, vector<3x128x1xf32>
    %14 = vector.broadcast %13 : vector<3x128x1xf32> to vector<3x128x128xf32>
    %15 = arith.mulf %14, %12 : vector<3x128x128xf32>
    %cst_11 = arith.constant dense<0.000000e+00> : vector<128x128xf32>
    %16 = vector.multi_reduction <add>, %15, %cst_11 [0] : vector<3x128x128xf32> to vector<128x128xf32>
    %c0_12 = arith.constant 0 : index
    %c0_13 = arith.constant 0 : index
    %17 = vector.load %arg1[%c0_12, %c0_13] : memref<128x32xbf16, #tpu.memory_space<vmem>>, vector<128x32xbf16>
    %c0_14 = arith.constant 0 : index
    %c0_15 = arith.constant 0 : index
    %18 = vector.load %arg6[%c0_14, %c0_15] : memref<32x128xbf16, #tpu.memory_space<vmem>>, vector<32x128xbf16>
    %cst_16 = arith.constant dense<0.000000e+00> : vector<128x128xf32>
    %19 = tpu.matmul %17, %18, %cst_16 {dimension_numbers = #tpu.dot_dimension_numbers<[1], [0], [0], [1], [0, 0, 1, 1], [], []>} : vector<128x32xbf16>, vector<32x128xbf16>, vector<128x128xf32> -> vector<128x128xf32>
    %20 = arith.truncf %16 : vector<128x128xf32> to vector<128x128xbf16>
    %c0_17 = arith.constant 0 : index
    %c0_18 = arith.constant 0 : index
    %21 = vector.load %arg7[%c0_17, %c0_18] : memref<128x128xbf16, #tpu.memory_space<vmem>>, vector<128x128xbf16>
    %cst_19 = arith.constant dense<0.000000e+00> : vector<128x128xf32>
    %22 = tpu.matmul %20, %21, %cst_19 {dimension_numbers = #tpu.dot_dimension_numbers<[1], [0], [0], [1], [0, 0, 1, 1], [], []>} : vector<128x128xbf16>, vector<128x128xbf16>, vector<128x128xf32> -> vector<128x128xf32>
    %23 = arith.addf %19, %22 : vector<128x128xf32>
    %c0_20 = arith.constant 0 : index
    %c0_21 = arith.constant 0 : index
    %24 = vector.load %arg8[%c0_20, %c0_21] : memref<1x128xf32, #tpu.memory_space<vmem>>, vector<1x128xf32>
    %25 = vector.broadcast %24 : vector<1x128xf32> to vector<128x128xf32>
    %26 = arith.addf %23, %25 : vector<128x128xf32>
    %cst_22 = arith.constant 0.000000e+00 : f32
    %27 = vector.broadcast %cst_22 : f32 to vector<128x128xf32>
    %28 = arith.cmpf ogt, %26, %27 : vector<128x128xf32>
    %cst_23 = arith.constant 0.00999999977 : f32
    %29 = vector.broadcast %cst_23 : f32 to vector<128x128xf32>
    %30 = arith.mulf %29, %26 : vector<128x128xf32>
    %31 = arith.select %28, %26, %30 : vector<128x128xi1>, vector<128x128xf32>
    %32 = arith.mulf %31, %31 : vector<128x128xf32>
    %cst_24 = arith.constant dense<0.000000e+00> : vector<128xf32>
    %33 = vector.multi_reduction <add>, %32, %cst_24 [1] : vector<128x128xf32> to vector<128xf32>
    %34 = vector.shape_cast %33 : vector<128xf32> to vector<128x1xf32>
    %cst_25 = arith.constant 9.99999996E-13 : f32
    %35 = vector.broadcast %cst_25 : f32 to vector<128x1xf32>
    %36 = arith.addf %34, %35 : vector<128x1xf32>
    %37 = math.rsqrt %36 : vector<128x1xf32>
    %38 = vector.broadcast %37 : vector<128x1xf32> to vector<128x128xf32>
    %39 = arith.mulf %31, %38 : vector<128x128xf32>
    %c0_26 = arith.constant 0 : index
    %c0_27 = arith.constant 0 : index
    %40 = vector.load %arg9[%c0_26, %c0_27] : memref<128x128xf32, #tpu.memory_space<vmem>>, vector<128x128xf32>
    tpu.vector_store %arg9[%c0_26, %c0_27], %39 {strides = array<i32>} : memref<128x128xf32, #tpu.memory_space<vmem>>, vector<128x128xf32>,
    return
  }
  func.func @transform_0(%arg0: i32) -> (i32, i32) {
    %c0_i32 = arith.constant 0 : i32
    %c0_i32_0 = arith.constant 0 : i32
    return %arg0, %c0_i32 : i32, i32
  }
  func.func @transform_1(%arg0: i32) -> (i32, i32, i32) {
    %c0_i32 = arith.constant 0 : i32
    %c0_i32_0 = arith.constant 0 : i32
    %c0_i32_1 = arith.constant 0 : i32
    return %c0_i32, %arg0, %c0_i32_0 : i32, i32, i32
  }
  func.func @transform_2(%arg0: i32) -> (i32, i32, i32) {
    %c0_i32 = arith.constant 0 : i32
    %c0_i32_0 = arith.constant 0 : i32
    %c0_i32_1 = arith.constant 0 : i32
    return %c0_i32, %arg0, %c0_i32_0 : i32, i32, i32
  }
  func.func @transform_3(%arg0: i32) -> (i32, i32) {
    %c0_i32 = arith.constant 0 : i32
    %c0_i32_0 = arith.constant 0 : i32
    %c0_i32_1 = arith.constant 0 : i32
    return %c0_i32, %c0_i32_0 : i32, i32
  }
  func.func @transform_4(%arg0: i32) -> (i32, i32) {
    %c0_i32 = arith.constant 0 : i32
    %c0_i32_0 = arith.constant 0 : i32
    %c0_i32_1 = arith.constant 0 : i32
    return %c0_i32, %c0_i32_0 : i32, i32
  }
  func.func @transform_5(%arg0: i32) -> (i32, i32) {
    %c0_i32 = arith.constant 0 : i32
    %c0_i32_0 = arith.constant 0 : i32
    %c0_i32_1 = arith.constant 0 : i32
    return %c0_i32, %c0_i32_0 : i32, i32
  }
  func.func @transform_6(%arg0: i32) -> (i32, i32) {
    %c0_i32 = arith.constant 0 : i32
    %c0_i32_0 = arith.constant 0 : i32
    %c0_i32_1 = arith.constant 0 : i32
    return %c0_i32, %c0_i32_0 : i32, i32
  }
  func.func @transform_7(%arg0: i32) -> (i32, i32) {
    %c0_i32 = arith.constant 0 : i32
    %c0_i32_0 = arith.constant 0 : i32
    %c0_i32_1 = arith.constant 0 : i32
    return %c0_i32, %c0_i32_0 : i32, i32
  }
  func.func @transform_8(%arg0: i32) -> (i32, i32) {
    %c0_i32 = arith.constant 0 : i32
    %c0_i32_0 = arith.constant 0 : i32
    return %arg0, %c0_i32 : i32, i32
  }
}

</mosaic_0001>

<bundles_post_ra>
// kernel: tpu_custom_call.1
= control target key start
LH: loop header
LB: loop body
LE: loop exit
PB: predicated region body
PF: predicated region fallthrough
CT: control target
= control target key end

     0   :  { %13 = vsyncpa [#allocation5], 0  ;;  %s3798_s0 = inlined_call_operand.vmem [shape: bf16[256,32], index: 0, kind: input, shape index: {}]   ;;  %s3799_s1 = inlined_call_operand.vmem [shape: bf16[3,256,32], index: 1, kind: input, shape index: {}]   ;;  %s3800_s2 = inlined_call_operand.vmem [shape: f32[3,256,1], index: 2, kind: input, shape index: {}]   ;;  %s3801_s3 = inlined_call_operand.vmem [shape: bf16[32,128], index: 3, kind: input, shape index: {}]   ;;  %s3802_s4 = inlined_call_operand.vmem [shape: f32[1,128], index: 4, kind: input, shape index: {}]   ;;  %s3803_s5 = inlined_call_operand.vmem [shape: bf16[32,128], index: 5, kind: input, shape index: {}]   ;;  %s3804_s6 = inlined_call_operand.vmem [shape: bf16[128,128], index: 6, kind: input, shape index: {}]   ;;  %s3805_s7 = inlined_call_operand.vmem [shape: f32[1,128], index: 7, kind: input, shape index: {}]   ;;  %s3806_s8 = inlined_call_operand.hbm [shape: f32[256,128], index: 8, kind: output, shape index: {}]  }
   0x1   :  { %15 = vsyncpa [#allocation5 + $0x1], 0  ;;  %s2967_s27 = smov 0   ;;  %s2969_s28 = smov 0  }
   0x2   :  { %s2971_s29 = smov 0   ;;  %s2973_s30 = smov 0  }
   0x3 LB: > { %s2988_s9 = sadd.s32 4294967295, %s2916_s30   ;;  %s2461_s10 = sadd.s32 4294967294, %s2916_s30   ;;  %s2916_s30 = sphi %s2973_s30, %s3822_s30   ;;  %s2912_s29 = sphi %s2971_s29, %s3821_s29   ;;  %s2908_s28 = sphi %s2969_s28, %s3820_s28   ;;  %s2904_s27 = sphi %s2967_s27, %s3819_s27  }
   0x4   : > { %s2992_s11 = sadd.s32 1, %s2916_s30   ;;  %s54_s12 = sadd.s32 1, %s2912_s29 }
   0x5   : > { %s51_s13 = ssub.s32 %s2916_s30, %s2992_s11  ;;  %p61_p0 = scmp.ne.s32.totalorder %s2912_s29, %s2908_s28 }
   0x6   : > { %p52_p1 = scmp.eq.s32.totalorder %s51_s13, 0  ;;  %p62_p2 = scmp.eq.s32.totalorder %s2916_s30, 0 }
   0x7   : > { %p222_p3 = scmp.eq.s32.totalorder %s2988_s9, 1  ;;  %p227_p4 = scmp.ne.s32.totalorder %s2908_s28, %s2904_s27 }
   0x8   : > { %s3004_s14 = scalar_select %p52_p1, %s2912_s29, %s54_s12  }
   0x9   : > { %p3006_p5 = por %p62_p2, %p61_p0  ;;  %p3010_p6 = por %p222_p3, %p61_p0 }
   0xa   : > { %p228_p7 = scmp.eq.s32.totalorder %s2461_s10, 1  ;;  %p2463_p9 = scmp.ge.s32.totalorder %s2916_s30, 2 }
   0xc   : > { %p3014_p8 = por %p228_p7, %p227_p4  ;;  %259 = sbr.rel (%p2463_p9) target bundleno = 65 (0x41), region = 36 }
  0x13   : > { %271 = sbr.rel (!%p3006_p5) target bundleno = 36 (0x24), region = 44  ;;  %s273_s18 = sand.u32 (%p3006_p5), 1, %s2912_s29  }
  0x14   : > { %s2555_s19 = sshll.u32 (%p3006_p5), %s2916_s30, 6  ;;  %s2730_s20 = smul.u32 (%p3006_p5), 192, %s273_s18 }
  0x15   : > { %s3028_s23 = scalar_lea.vmem (%p3006_p5), %s3799_s1, %s2555_s19 }
  0x16   : > { %v294_v0 = vld [vmem:[%s3028_s23] sm:$0xff] (%p3006_p5)   ;;  %v298_v1 = vld [vmem:[%s3028_s23 + $0x8] sm:$0xff] (%p3006_p5)   ;;  %v302_v2 = vld [vmem:[%s3028_s23 + $0x10] sm:$0xff] (%p3006_p5)   ;;  %s3036_s24 = scalar_lea.vmem (%p3006_p5), [#allocation2], %s2730_s20 }
  0x17   : > { %v306_v3 = vld [vmem:[%s3028_s23 + $0x18] sm:$0xff] (%p3006_p5)   ;;  %v310_v4 = vld [vmem:[%s3028_s23 + $0x20] sm:$0xff] (%p3006_p5)   ;;  %v314_v5 = vld [vmem:[%s3028_s23 + $0x28] sm:$0xff] (%p3006_p5)   ;;  %295 = vst [vmem:[%s3036_s24] sm:$0xff] (%p3006_p5), %v294_v0  }
  0x18   : > { %299 = vst [vmem:[%s3036_s24 + $0x8] sm:$0xff] (%p3006_p5), %v298_v1   ;;  %303 = vst [vmem:[%s3036_s24 + $0x10] sm:$0xff] (%p3006_p5), %v302_v2   ;;  %v318_v6 = vld [vmem:[%s3028_s23 + $0x30] sm:$0xff] (%p3006_p5)   ;;  %v322_v7 = vld [vmem:[%s3028_s23 + $0x38] sm:$0xff] (%p3006_p5)  }
  0x19   : > { %307 = vst [vmem:[%s3036_s24 + $0x18] sm:$0xff] (%p3006_p5), %v306_v3   ;;  %311 = vst [vmem:[%s3036_s24 + $0x20] sm:$0xff] (%p3006_p5), %v310_v4   ;;  %v326_v8 = vld [vmem:[%s3028_s23 + $0x80] sm:$0xff] (%p3006_p5)   ;;  %v330_v9 = vld [vmem:[%s3028_s23 + $0x88] sm:$0xff] (%p3006_p5)  }
  0x1a   : > { %315 = vst [vmem:[%s3036_s24 + $0x28] sm:$0xff] %v314_v5   ;;  %319 = vst [vmem:[%s3036_s24 + $0x30] sm:$0xff] %v318_v6   ;;  %v334_v10 = vld [vmem:[%s3028_s23 + $0x90] sm:$0xff]   ;;  %v338_v11 = vld [vmem:[%s3028_s23 + $0x98] sm:$0xff]  }
  0x1b   : > { %323 = vst [vmem:[%s3036_s24 + $0x38] sm:$0xff] %v322_v7   ;;  %327 = vst [vmem:[%s3036_s24 + $0x40] sm:$0xff] %v326_v8   ;;  %v342_v12 = vld [vmem:[%s3028_s23 + $0xa0] sm:$0xff]   ;;  %v346_v13 = vld [vmem:[%s3028_s23 + $0xa8] sm:$0xff]  }
  0x1c   : > { %331 = vst [vmem:[%s3036_s24 + $0x48] sm:$0xff] %v330_v9   ;;  %335 = vst [vmem:[%s3036_s24 + $0x50] sm:$0xff] %v334_v10   ;;  %v350_v14 = vld [vmem:[%s3028_s23 + $0xb0] sm:$0xff]   ;;  %v354_v15 = vld [vmem:[%s3028_s23 + $0xb8] sm:$0xff]  }
  0x1d   : > { %339 = vst [vmem:[%s3036_s24 + $0x58] sm:$0xff] %v338_v11   ;;  %343 = vst [vmem:[%s3036_s24 + $0x60] sm:$0xff] %v342_v12   ;;  %v358_v16 = vld [vmem:[%s3028_s23 + $0x100] sm:$0xff]   ;;  %v362_v17 = vld [vmem:[%s3028_s23 + $0x108] sm:$0xff]  }
  0x1e   : > { %347 = vst [vmem:[%s3036_s24 + $0x68] sm:$0xff] %v346_v13   ;;  %351 = vst [vmem:[%s3036_s24 + $0x70] sm:$0xff] %v350_v14   ;;  %v366_v18 = vld [vmem:[%s3028_s23 + $0x110] sm:$0xff]   ;;  %v370_v19 = vld [vmem:[%s3028_s23 + $0x118] sm:$0xff]  }
  0x1f   : > { %355 = vst [vmem:[%s3036_s24 + $0x78] sm:$0xff] %v354_v15   ;;  %359 = vst [vmem:[%s3036_s24 + $0x80] sm:$0xff] %v358_v16   ;;  %v374_v20 = vld [vmem:[%s3028_s23 + $0x120] sm:$0xff]   ;;  %v378_v21 = vld [vmem:[%s3028_s23 + $0x128] sm:$0xff]  }
  0x20   : > { %363 = vst [vmem:[%s3036_s24 + $0x88] sm:$0xff] %v362_v17   ;;  %367 = vst [vmem:[%s3036_s24 + $0x90] sm:$0xff] %v366_v18   ;;  %v382_v22 = vld [vmem:[%s3028_s23 + $0x130] sm:$0xff]   ;;  %v386_v23 = vld [vmem:[%s3028_s23 + $0x138] sm:$0xff]  }
  0x21   : > { %371 = vst [vmem:[%s3036_s24 + $0x98] sm:$0xff] %v370_v19   ;;  %375 = vst [vmem:[%s3036_s24 + $0xa0] sm:$0xff] %v374_v20  }
  0x22   : > { %379 = vst [vmem:[%s3036_s24 + $0xa8] sm:$0xff] %v378_v21   ;;  %383 = vst [vmem:[%s3036_s24 + $0xb0] sm:$0xff] %v382_v22  }
  0x23   : > { %387 = vst [vmem:[%s3036_s24 + $0xb8] sm:$0xff] %v386_v23  }
  0x24 PF: > { %508 = sbr.rel (!%p3006_p5) target bundleno = 65 (0x41), region = 85  ;;  %s510_s25 = sand.u32 (%p3006_p5), 1, %s2912_s29  }
  0x25   : > { %s2556_s26 = sshll.u32 (%p3006_p5), %s2916_s30, 7  ;;  %s2731_s10 = smul.u32 (%p3006_p5), 384, %s510_s25 }
  0x26   : > { %s3087_s18 = scalar_lea.vmem (%p3006_p5), %s3800_s2, %s2556_s26 }
  0x27   : > { %v637_v24 = vld [vmem:[%s3087_s18] sm:$0xff] (%p3006_p5)  ;;  %v639_v25 = vld [vmem:[%s3087_s18 + $0x8] sm:$0xff] (%p3006_p5)  ;;  %v641_v26 = vld [vmem:[%s3087_s18 + $0x10] sm:$0xff] (%p3006_p5)  ;;  %s3095_s15 = scalar_lea.vmem (%p3006_p5), [#allocation3], %s2731_s10 }
  0x28   : > { %v643_v27 = vld [vmem:[%s3087_s18 + $0x18] sm:$0xff] (%p3006_p5)  ;;  %v645_v28 = vld [vmem:[%s3087_s18 + $0x20] sm:$0xff] (%p3006_p5)  ;;  %v647_v29 = vld [vmem:[%s3087_s18 + $0x28] sm:$0xff] (%p3006_p5)  ;;  %638 = vst [vmem:[%s3095_s15] sm:$0xff] (%p3006_p5), %v637_v24 }
  0x29   : > { %640 = vst [vmem:[%s3095_s15 + $0x8] sm:$0xff] (%p3006_p5), %v639_v25  ;;  %642 = vst [vmem:[%s3095_s15 + $0x10] sm:$0xff] (%p3006_p5), %v641_v26  ;;  %v649_v30 = vld [vmem:[%s3087_s18 + $0x30] sm:$0xff] (%p3006_p5)  ;;  %v651_v31 = vld [vmem:[%s3087_s18 + $0x38] sm:$0xff] (%p3006_p5) }
  0x2a   : > { %644 = vst [vmem:[%s3095_s15 + $0x18] sm:$0xff] (%p3006_p5), %v643_v27  ;;  %646 = vst [vmem:[%s3095_s15 + $0x20] sm:$0xff] (%p3006_p5), %v645_v28  ;;  %v653_v32 = vld [vmem:[%s3087_s18 + $0x40] sm:$0xff] (%p3006_p5)  ;;  %v655_v33 = vld [vmem:[%s3087_s18 + $0x48] sm:$0xff] (%p3006_p5) }
  0x2b   : > { %648 = vst [vmem:[%s3095_s15 + $0x28] sm:$0xff] %v647_v29  ;;  %650 = vst [vmem:[%s3095_s15 + $0x30] sm:$0xff] %v649_v30  ;;  %v657_v34 = vld [vmem:[%s3087_s18 + $0x50] sm:$0xff]  ;;  %v659_v35 = vld [vmem:[%s3087_s18 + $0x58] sm:$0xff] }
  0x2c   : > { %652 = vst [vmem:[%s3095_s15 + $0x38] sm:$0xff] %v651_v31  ;;  %654 = vst [vmem:[%s3095_s15 + $0x40] sm:$0xff] %v653_v32  ;;  %v661_v36 = vld [vmem:[%s3087_s18 + $0x60] sm:$0xff]  ;;  %v663_v37 = vld [vmem:[%s3087_s18 + $0x68] sm:$0xff] }
  0x2d   : > { %656 = vst [vmem:[%s3095_s15 + $0x48] sm:$0xff] %v655_v33  ;;  %658 = vst [vmem:[%s3095_s15 + $0x50] sm:$0xff] %v657_v34  ;;  %v665_v38 = vld [vmem:[%s3087_s18 + $0x70] sm:$0xff]  ;;  %v667_v39 = vld [vmem:[%s3087_s18 + $0x78] sm:$0xff] }
  0x2e   : > { %660 = vst [vmem:[%s3095_s15 + $0x58] sm:$0xff] %v659_v35  ;;  %662 = vst [vmem:[%s3095_s15 + $0x60] sm:$0xff] %v661_v36  ;;  %v669_v40 = vld [vmem:[%s3087_s18 + $0x100] sm:$0xff]  ;;  %v671_v41 = vld [vmem:[%s3087_s18 + $0x108] sm:$0xff] }
  0x2f   : > { %664 = vst [vmem:[%s3095_s15 + $0x68] sm:$0xff] %v663_v37  ;;  %666 = vst [vmem:[%s3095_s15 + $0x70] sm:$0xff] %v665_v38  ;;  %v673_v42 = vld [vmem:[%s3087_s18 + $0x110] sm:$0xff]  ;;  %v675_v43 = vld [vmem:[%s3087_s18 + $0x118] sm:$0xff] }
  0x30   : > { %668 = vst [vmem:[%s3095_s15 + $0x78] sm:$0xff] %v667_v39  ;;  %670 = vst [vmem:[%s3095_s15 + $0x80] sm:$0xff] %v669_v40  ;;  %v677_v44 = vld [vmem:[%s3087_s18 + $0x120] sm:$0xff]  ;;  %v679_v45 = vld [vmem:[%s3087_s18 + $0x128] sm:$0xff] }
  0x31   : > { %672 = vst [vmem:[%s3095_s15 + $0x88] sm:$0xff] %v671_v41  ;;  %674 = vst [vmem:[%s3095_s15 + $0x90] sm:$0xff] %v673_v42  ;;  %v681_v46 = vld [vmem:[%s3087_s18 + $0x130] sm:$0xff]  ;;  %v683_v47 = vld [vmem:[%s3087_s18 + $0x138] sm:$0xff] }
  0x32   : > { %676 = vst [vmem:[%s3095_s15 + $0x98] sm:$0xff] %v675_v43  ;;  %678 = vst [vmem:[%s3095_s15 + $0xa0] sm:$0xff] %v677_v44  ;;  %v685_v48 = vld [vmem:[%s3087_s18 + $0x140] sm:$0xff]  ;;  %v687_v49 = vld [vmem:[%s3087_s18 + $0x148] sm:$0xff] }
  0x33   : > { %680 = vst [vmem:[%s3095_s15 + $0xa8] sm:$0xff] %v679_v45  ;;  %682 = vst [vmem:[%s3095_s15 + $0xb0] sm:$0xff] %v681_v46  ;;  %v689_v50 = vld [vmem:[%s3087_s18 + $0x150] sm:$0xff]  ;;  %v691_v51 = vld [vmem:[%s3087_s18 + $0x158] sm:$0xff] }
  0x34   : > { %684 = vst [vmem:[%s3095_s15 + $0xb8] sm:$0xff] %v683_v47  ;;  %686 = vst [vmem:[%s3095_s15 + $0xc0] sm:$0xff] %v685_v48  ;;  %v693_v52 = vld [vmem:[%s3087_s18 + $0x160] sm:$0xff]  ;;  %v695_v53 = vld [vmem:[%s3087_s18 + $0x168] sm:$0xff] }
  0x35   : > { %688 = vst [vmem:[%s3095_s15 + $0xc8] sm:$0xff] %v687_v49  ;;  %690 = vst [vmem:[%s3095_s15 + $0xd0] sm:$0xff] %v689_v50  ;;  %v697_v54 = vld [vmem:[%s3087_s18 + $0x170] sm:$0xff]  ;;  %v699_v55 = vld [vmem:[%s3087_s18 + $0x178] sm:$0xff] }
  0x36   : > { %692 = vst [vmem:[%s3095_s15 + $0xd8] sm:$0xff] %v691_v51  ;;  %694 = vst [vmem:[%s3095_s15 + $0xe0] sm:$0xff] %v693_v52  ;;  %v701_v56 = vld [vmem:[%s3087_s18 + $0x200] sm:$0xff]  ;;  %v703_v57 = vld [vmem:[%s3087_s18 + $0x208] sm:$0xff] }
  0x37   : > { %696 = vst [vmem:[%s3095_s15 + $0xe8] sm:$0xff] %v695_v53  ;;  %698 = vst [vmem:[%s3095_s15 + $0xf0] sm:$0xff] %v697_v54  ;;  %v705_v58 = vld [vmem:[%s3087_s18 + $0x210] sm:$0xff]  ;;  %v707_v59 = vld [vmem:[%s3087_s18 + $0x218] sm:$0xff] }
  0x38   : > { %700 = vst [vmem:[%s3095_s15 + $0xf8] sm:$0xff] %v699_v55  ;;  %702 = vst [vmem:[%s3095_s15 + $0x100] sm:$0xff] %v701_v56  ;;  %v709_v60 = vld [vmem:[%s3087_s18 + $0x220] sm:$0xff]  ;;  %v711_v61 = vld [vmem:[%s3087_s18 + $0x228] sm:$0xff] }
  0x39   : > { %704 = vst [vmem:[%s3095_s15 + $0x108] sm:$0xff] %v703_v57  ;;  %706 = vst [vmem:[%s3095_s15 + $0x110] sm:$0xff] %v705_v58  ;;  %v713_v62 = vld [vmem:[%s3087_s18 + $0x230] sm:$0xff]  ;;  %v715_v63 = vld [vmem:[%s3087_s18 + $0x238] sm:$0xff] }
  0x3a   : > { %708 = vst [vmem:[%s3095_s15 + $0x118] sm:$0xff] %v707_v59  ;;  %710 = vst [vmem:[%s3095_s15 + $0x120] sm:$0xff] %v709_v60  ;;  %v717_v0 = vld [vmem:[%s3087_s18 + $0x240] sm:$0xff]  ;;  %v719_v1 = vld [vmem:[%s3087_s18 + $0x248] sm:$0xff] }
  0x3b   : > { %712 = vst [vmem:[%s3095_s15 + $0x128] sm:$0xff] %v711_v61  ;;  %714 = vst [vmem:[%s3095_s15 + $0x130] sm:$0xff] %v713_v62  ;;  %v721_v2 = vld [vmem:[%s3087_s18 + $0x250] sm:$0xff]  ;;  %v723_v3 = vld [vmem:[%s3087_s18 + $0x258] sm:$0xff] }
  0x3c   : > { %716 = vst [vmem:[%s3095_s15 + $0x138] sm:$0xff] %v715_v63  ;;  %718 = vst [vmem:[%s3095_s15 + $0x140] sm:$0xff] %v717_v0  ;;  %v725_v4 = vld [vmem:[%s3087_s18 + $0x260] sm:$0xff]  ;;  %v727_v5 = vld [vmem:[%s3087_s18 + $0x268] sm:$0xff] }
  0x3d   : > { %720 = vst [vmem:[%s3095_s15 + $0x148] sm:$0xff] %v719_v1  ;;  %722 = vst [vmem:[%s3095_s15 + $0x150] sm:$0xff] %v721_v2  ;;  %v729_v6 = vld [vmem:[%s3087_s18 + $0x270] sm:$0xff]  ;;  %v731_v7 = vld [vmem:[%s3087_s18 + $0x278] sm:$0xff] }
  0x3e   : > { %724 = vst [vmem:[%s3095_s15 + $0x158] sm:$0xff] %v723_v3  ;;  %726 = vst [vmem:[%s3095_s15 + $0x160] sm:$0xff] %v725_v4 }
  0x3f   : > { %728 = vst [vmem:[%s3095_s15 + $0x168] sm:$0xff] %v727_v5  ;;  %730 = vst [vmem:[%s3095_s15 + $0x170] sm:$0xff] %v729_v6 }
  0x40   : > { %732 = vst [vmem:[%s3095_s15 + $0x178] sm:$0xff] %v731_v7 }
  0x41 PF: > { %p2468_p10 = scmp.ge.s32.totalorder %s2916_s30, 1  ;;  %p737_p11 = scmp.lt.s32.totalorder %s2916_s30, 3 }
  0x43   : > { %p738_p12 = pnand %p2468_p10, %p737_p11 }
  0x45   : > { %741 = sbr.rel (%p738_p12) target bundleno = 832 (0x340), region = 123 }
  0x4c   : > { %v2778_v8 = vld [vmem:[%s3801_s3] sm:$0xff]   ;;  %v2918_v9 = vmov 0   ;;  %v2779_v10 = vld [vmem:[%s3801_s3 + $0x8] sm:$0xff]   ;;  %s3196_s23 = sand.u32 1, %s2908_s28   ;;  %vm994_vm0 = vcmask 261120   ;;  %s2470_s21 = sshll.u32 %s2988_s9, 4 }
  0x4d   : > { %2777 = vset.pattern.permute.xlu1 %v2918_v9  ;;  %2776 = vset.pattern.permute.xlu0 %v2918_v9  ;;  %s2733_s24 = smul.u32 384, %s3196_s23  ;;  %p794_p13 = scmp.lt.s32.totalorder %s2470_s21, 31 }
  0x4e   : > { %2610 = vmatprep.subr.bf16.mxu0 %v2778_v8  ;;  %s2732_s25 = smul.u32 192, %s3196_s23  ;;  %s2469_s20 = sshll.u32 %s3196_s23, 7 }
  0x4f   : > { %2611 = vmatpush3.bf16.msra.mxu0 %v2778_v8  ;;  %s3200_s26 = scalar_lea.vmem [#allocation3], %s2733_s24  ;;  %s3824_s21 = smov (!%p794_p13, %s2470_s21), 31 }
  0x50   : > { %2612 = vmatprep.subr.bf16.mxu0 %v2779_v10  ;;  %v1452_v11 = vld [vmem:[%s3200_s26 + $0x80] sm:$0xff]  ;;  %v1453_v13 = vld [vmem:[%s3200_s26 + $0x88] sm:$0xff]  ;;  %s3205_s10 = scalar_lea.vmem [#allocation2], %s2732_s25  ;;  %v1439_v18 = vld [vmem:[%s3200_s26 + $0x18] sm:$0xff]  ;;  %s2471_s22 = sshll.u32 %s3824_s21, 2 }
  0x51   : > { %v1436_v12 = vld [vmem:[%s3200_s26] sm:$0xff]  ;;  %1566 = vperm.xlu1 %2777, %v1452_v11   ;;  %v2781_v15 = vld [vmem:[%s3205_s10 + $0x8] sm:$0xff]   ;;  %v2782_v17 = vld [vmem:[%s3205_s10 + $0x10] sm:$0xff]   ;;  %s3714_s21 = scalar_lea.vmem [#allocation4], %s2469_s20  ;;  %s2919_s13 = smov [#allocation4]  }
  0x52   : > { %1486 = vperm.xlu0 %2776, %v1436_v12   ;;  %v2780_v14 = vld [vmem:[%s3205_s10] sm:$0xff]   ;;  %v1437_v16 = vld [vmem:[%s3200_s26 + $0x8] sm:$0xff]  ;;  %v1438_v19 = vld [vmem:[%s3200_s26 + $0x10] sm:$0xff]  ;;  %s2363_s24 = sshll.u32 %s3714_s21, 4  ;;  %s2858_s18 = sshll.u32 %s2919_s13, 4  ;;  %s3752_s24 = int_to_ptr.vmem [resolvable:$true] %s2363_s24  ;;  %s2859_s18 = int_to_ptr.vmem [resolvable:$false] %s2858_s18 }
  0x53   : > { %2613 = vmatpush3.bf16.msra.mxu0 %v2779_v10  ;;  %2614 = vmatprep.mubr.msk.bf16.mxu0 %vm994_vm0, %v2780_v14  ;;  %v2783_v20 = vld [vmem:[%s3205_s10 + $0x18] sm:$0xff]   ;;  %v2784_v22 = vld [vmem:[%s3205_s10 + $0x20] sm:$0xff]   ;;  %v1454_v23 = vld [vmem:[%s3200_s26 + $0x90] sm:$0xff]  ;;  %s2854_s12 = scalar_lea.vmem %s3752_s24, 2048  ;;  %s2860_s15 = scalar_lea.vmem %s2859_s18, 4096 }
  0x54   : > { %v1455_v21 = vld [vmem:[%s3200_s26 + $0x98] sm:$0xff]  ;;  %v1469_v24 = vld [vmem:[%s3200_s26 + $0x108] sm:$0xff]  ;;  %v1468_v25 = vld [vmem:[%s3200_s26 + $0x100] sm:$0xff]  ;;  %p2855_p0 = scmp.ne.s32.totalorder %s3752_s24, %s2854_s12  ;;  %p2861_p3 = scmp.lt.s32.totalorder %s3752_s24, %s2859_s18 }
  0x55   : > { %1571 = vperm.xlu1 %2777, %v1453_v13   ;;  %v2785_v26 = vld [vmem:[%s3205_s10 + $0x28] sm:$0xff]   ;;  %v1471_v27 = vld [vmem:[%s3200_s26 + $0x118] sm:$0xff]  ;;  %v2786_v28 = vld [vmem:[%s3205_s10 + $0x30] sm:$0xff]   ;;  %p2862_p4 = scmp.lt.s32.totalorder %s2860_s15, %s2854_s12 }
  0x56   : > { %2615 = vmatmul.mubr.msk.bf16.vlgmr.msra.gmra.mrb[0].mxu0 %vm994_vm0, %v2781_v15  ;;  %1491 = vperm.xlu0 %2776, %v1437_v16   ;;  %v1470_v29 = vld [vmem:[%s3200_s26 + $0x110] sm:$0xff]  ;;  %v1441_v30 = vld [vmem:[%s3200_s26 + $0x28] sm:$0xff]  ;;  %v1440_v31 = vld [vmem:[%s3200_s26 + $0x20] sm:$0xff]  ;;  %p2856_p1 = pnand %p2855_p0, %p3010_p6 }
  0x57   : > { %2618 = vmatprep.mubr.msk.bf16.mxu0 %vm994_vm0, %v2782_v17  ;;  %v2787_v32 = vld [vmem:[%s3205_s10 + $0x38] sm:$0xff]   ;;  %v1457_v33 = vld [vmem:[%s3200_s26 + $0xa8] sm:$0xff]  ;;  %v2788_v34 = vld [vmem:[%s3205_s10 + $0x40] sm:$0xff]   ;;  %p2863_p5 = por %p2862_p4, %p2861_p3 }
  0x58   : > { %v1456_v35 = vld [vmem:[%s3200_s26 + $0xa0] sm:$0xff]  ;;  %v1443_v36 = vld [vmem:[%s3200_s26 + $0x38] sm:$0xff]  ;;  %v1442_v37 = vld [vmem:[%s3200_s26 + $0x30] sm:$0xff]  ;;  %p2857_p2 = pneg %p2856_p1 }
  0x59   : > { %1501 = vperm.xlu1 %2777, %v1439_v18   ;;  %v2789_v38 = vld [vmem:[%s3205_s10 + $0x48] sm:$0xff]   ;;  %v1459_v39 = vld [vmem:[%s3200_s26 + $0xb8] sm:$0xff]  ;;  %v2790_v40 = vld [vmem:[%s3205_s10 + $0x50] sm:$0xff]  }
  0x5a   : > { %1496 = vperm.xlu0 %2776, %v1438_v19   ;;  %v1458_v41 = vld [vmem:[%s3200_s26 + $0xb0] sm:$0xff]  ;;  %v1473_v42 = vld [vmem:[%s3200_s26 + $0x128] sm:$0xff]  ;;  %v1472_v43 = vld [vmem:[%s3200_s26 + $0x120] sm:$0xff]  ;;  %p2864_p7 = pnand %p2863_p5, %p2857_p2 }
  0x5b   : > { %v2791_v44 = vld [vmem:[%s3205_s10 + $0x58] sm:$0xff]   ;;  %v2792_v46 = vld [vmem:[%s3205_s10 + $0x60] sm:$0xff]   ;;  %v1474_v47 = vld [vmem:[%s3200_s26 + $0x130] sm:$0xff] }
  0x5c   : > { %v1475_v45 = vld [vmem:[%s3200_s26 + $0x138] sm:$0xff]  ;;  %v1445_v48 = vld [vmem:[%s3200_s26 + $0x48] sm:$0xff]  ;;  %v1444_v49 = vld [vmem:[%s3200_s26 + $0x40] sm:$0xff] }
  0x5d   : > { %1581 = vperm.xlu1 %2777, %v1455_v21   ;;  %v2793_v50 = vld [vmem:[%s3205_s10 + $0x68] sm:$0xff]   ;;  %v2794_v52 = vld [vmem:[%s3205_s10 + $0x70] sm:$0xff]   ;;  %v1460_v53 = vld [vmem:[%s3200_s26 + $0xc0] sm:$0xff] }
  0x5e   : > { %2619 = vmatmul.mubr.msk.bf16.gmra.mrb[4].mxu0 %vm994_vm0, %v2783_v20  ;;  %1576 = vperm.xlu0 %2776, %v1454_v23   ;;  %v1461_v51 = vld [vmem:[%s3200_s26 + $0xc8] sm:$0xff]  ;;  %v1447_v54 = vld [vmem:[%s3200_s26 + $0x58] sm:$0xff]  ;;  %v1446_v55 = vld [vmem:[%s3200_s26 + $0x50] sm:$0xff] }
  0x5f   : > { %2622 = vmatprep.mubr.msk.bf16.mxu0 %vm994_vm0, %v2784_v22  ;;  %v2795_v56 = vld [vmem:[%s3205_s10 + $0x78] sm:$0xff]   ;;  %v2796_v58 = vld [vmem:[%s3205_s10 + $0x80] sm:$0xff]   ;;  %v1462_v59 = vld [vmem:[%s3200_s26 + $0xd0] sm:$0xff] }
  0x60   : > { %v1463_v57 = vld [vmem:[%s3200_s26 + $0xd8] sm:$0xff]  ;;  %v1477_v60 = vld [vmem:[%s3200_s26 + $0x148] sm:$0xff]  ;;  %v1476_v61 = vld [vmem:[%s3200_s26 + $0x140] sm:$0xff] }
  0x61   : > { %1651 = vperm.xlu1 %2777, %v1469_v24   ;;  %v2797_v62 = vld [vmem:[%s3205_s10 + $0x88] sm:$0xff]   ;;  %v1479_v63 = vld [vmem:[%s3200_s26 + $0x158] sm:$0xff]  ;;  %v2798_v0 = vld [vmem:[%s3205_s10 + $0x90] sm:$0xff]  }
  0x62   : > { %1646 = vperm.xlu0 %2776, %v1468_v25   ;;  %v1478_v1 = vld [vmem:[%s3200_s26 + $0x150] sm:$0xff]  ;;  %v1449_v2 = vld [vmem:[%s3200_s26 + $0x68] sm:$0xff]  ;;  %v1448_v3 = vld [vmem:[%s3200_s26 + $0x60] sm:$0xff] }
  0x63   : > { %v2799_v4 = vld [vmem:[%s3205_s10 + $0x98] sm:$0xff]   ;;  %v1465_v5 = vld [vmem:[%s3200_s26 + $0xe8] sm:$0xff]  ;;  %v2800_v6 = vld [vmem:[%s3205_s10 + $0xa0] sm:$0xff]  }
  0x64   : > { %v1464_v7 = vld [vmem:[%s3200_s26 + $0xe0] sm:$0xff]  ;;  %v1451_v8 = vld [vmem:[%s3200_s26 + $0x78] sm:$0xff]  ;;  %v1450_v9 = vld [vmem:[%s3200_s26 + $0x70] sm:$0xff] }
  0x65   : > { %1661 = vperm.xlu1 %2777, %v1471_v27   ;;  %v2801_v10 = vld [vmem:[%s3205_s10 + $0xa8] sm:$0xff]   ;;  %v1467_v11 = vld [vmem:[%s3200_s26 + $0xf8] sm:$0xff]  ;;  %v2802_v12 = vld [vmem:[%s3205_s10 + $0xb0] sm:$0xff]  }
  0x66   : > { %2623 = vmatmul.mubr.msk.bf16.gmra.mrb[8].mxu0 %vm994_vm0, %v2785_v26  ;;  %1656 = vperm.xlu0 %2776, %v1470_v29   ;;  %v1466_v13 = vld [vmem:[%s3200_s26 + $0xf0] sm:$0xff]  ;;  %v1481_v14 = vld [vmem:[%s3200_s26 + $0x168] sm:$0xff]  ;;  %v1480_v15 = vld [vmem:[%s3200_s26 + $0x160] sm:$0xff] }
  0x67   : > { %2626 = vmatprep.mubr.msk.bf16.mxu0 %vm994_vm0, %v2786_v28  ;;  %v2803_v16 = vld [vmem:[%s3205_s10 + $0xb8] sm:$0xff]   ;;  %v1482_v18 = vld [vmem:[%s3200_s26 + $0x170] sm:$0xff]  ;;  %v2804_v19 = vld [vmem:[%s3804_s6] sm:$0xff]  }
  0x68   : > { %v1483_v17 = vld [vmem:[%s3200_s26 + $0x178] sm:$0xff]  ;;  %2662 = vmatprep.subr.bf16.mxu1 %v2804_v19  ;;  %v2805_v20 = vld [vmem:[%s3804_s6 + $0x8] sm:$0xff]   ;;  %v2806_v21 = vld [vmem:[%s3804_s6 + $0x10] sm:$0xff]   ;;  %s3364_s26 = scalar_lea.vmem %s3798_s0, %s2471_s22  ;;  %s2557_s22 = sshll.u32 %s2988_s9, 11 }
  0x69   : > { %1511 = vperm.xlu1 %2777, %v1441_v30   ;;  %2663 = vmatpush3.bf16.msra.mxu1 %v2804_v19  ;;  %v2807_v22 = vld [vmem:[%s3804_s6 + $0x18] sm:$0xff]   ;;  %v2808_v23 = vld [vmem:[%s3804_s6 + $0x20] sm:$0xff]   ;;  %v2809_v26 = vld [vmem:[%s3804_s6 + $0x28] sm:$0xff]   ;;  %s3750_s10 = scalar_lea.hbm %s3806_s8, %s2557_s22  ;;  %s2350_s9 = scalar_lea.sflag [#allocation5], %s3196_s23 }
  0x6a   : > { %1506 = vperm.xlu0 %2776, %v1440_v31   ;;  %2664 = vmatprep.subr.bf16.mxu1 %v2805_v20  ;;  %v2810_v28 = vld [vmem:[%s3804_s6 + $0x30] sm:$0xff]   ;;  %v2811_v30 = vld [vmem:[%s3804_s6 + $0x38] sm:$0xff]  }
  0x6d   : > { %1591 = vperm.xlu1 %2777, %v1457_v33   ;;  %2665 = vmatpush3.bf16.msra.mxu1 %v2805_v20 }
  0x6e   : > { %2627 = vmatmul.mubr.msk.bf16.gmra.mrb[12].mxu0 %vm994_vm0, %v2787_v32  ;;  %1586 = vperm.xlu0 %2776, %v1456_v35  }
  0x6f   : > { %2630 = vmatprep.mubr.msk.bf16.mxu0 %vm994_vm0, %v2788_v34  ;;  %2666 = vmatprep.subr.bf16.mxu1 %v2806_v21  ;;  %v3339_v34 = vld [vmem:[%s3803_s5] sm:$0xff]  }
  0x70   : > { %3811 = vst [vmem:[#allocation7_spill] sm:$0xff] %v3339_v34 }
  0x71   : > { %1521 = vperm.xlu1 %2777, %v1443_v36   ;;  %2667 = vmatpush3.bf16.msra.mxu1 %v2806_v21 }
  0x72   : > { %1516 = vperm.xlu0 %2776, %v1442_v37   ;;  %2668 = vmatprep.subr.bf16.mxu1 %v2807_v22 }
  0x75   : > { %1601 = vperm.xlu1 %2777, %v1459_v39   ;;  %2669 = vmatpush3.bf16.msra.mxu1 %v2807_v22 }
  0x76   : > { %2631 = vmatmul.mubr.msk.bf16.gmra.mrb[16].mxu0 %vm994_vm0, %v2789_v38  ;;  %1596 = vperm.xlu0 %2776, %v1458_v41  }
  0x77   : > { %2634 = vmatprep.mubr.msk.bf16.mxu0 %vm994_vm0, %v2790_v40  ;;  %2670 = vmatprep.subr.bf16.mxu1 %v2808_v23 }
  0x79   : > { %1671 = vperm.xlu1 %2777, %v1473_v42   ;;  %2671 = vmatpush3.bf16.msra.mxu1 %v2808_v23 }
  0x7a   : > { %1666 = vperm.xlu0 %2776, %v1472_v43   ;;  %2672 = vmatprep.subr.bf16.mxu1 %v2809_v26 }
  0x7d   : > { %1681 = vperm.xlu1 %2777, %v1475_v45   ;;  %2673 = vmatpush3.bf16.msra.mxu1 %v2809_v26 }
  0x7e   : > { %2635 = vmatmul.mubr.msk.bf16.gmra.mrb[20].mxu0 %vm994_vm0, %v2791_v44  ;;  %1676 = vperm.xlu0 %2776, %v1474_v47  }
  0x7f   : > { %2638 = vmatprep.mubr.msk.bf16.mxu0 %vm994_vm0, %v2792_v46  ;;  %2674 = vmatprep.subr.bf16.mxu1 %v2810_v28 }
  0x81   : > { %1531 = vperm.xlu1 %2777, %v1445_v48   ;;  %2675 = vmatpush3.bf16.msra.mxu1 %v2810_v28 }
  0x82   : > { %1526 = vperm.xlu0 %2776, %v1444_v49   ;;  %2676 = vmatprep.subr.bf16.mxu1 %v2811_v30 }
  0x85   : > { %1611 = vperm.xlu1 %2777, %v1461_v51   ;;  %2677 = vmatpush3.bf16.msra.mxu1 %v2811_v30 }
  0x86   : > { %2639 = vmatmul.mubr.msk.bf16.gmra.mrb[24].mxu0 %vm994_vm0, %v2793_v50  ;;  %1606 = vperm.xlu0 %2776, %v1460_v53   ;;  %v3381_v50 = vld [vmem:[%s3802_s4] ss:$0 sm:$0xff] }
  0x87   : > { %2642 = vmatprep.mubr.msk.bf16.mxu0 %vm994_vm0, %v2794_v52  ;;  %2694 = vmatprep.subr.bf16.mxu1 %v3339_v34 }
  0x89   : > { %1541 = vperm.xlu1 %2777, %v1447_v54  }
  0x8a   : > { %1536 = vperm.xlu0 %2776, %v1446_v55  }
  0x8d   : > { %1621 = vperm.xlu1 %2777, %v1463_v57  }
  0x8e   : > { %2643 = vmatmul.mubr.msk.bf16.gmra.mrb[28].mxu0 %vm994_vm0, %v2795_v56  ;;  %1616 = vperm.xlu0 %2776, %v1462_v59  }
  0x8f   : > { %2646 = vmatprep.mubr.msk.bf16.mxu0 %vm994_vm0, %v2796_v58 }
  0x91   : > { %1691 = vperm.xlu1 %2777, %v1477_v60  }
  0x92   : > { %1686 = vperm.xlu0 %2776, %v1476_v61  }
  0x95   : > { %1701 = vperm.xlu1 %2777, %v1479_v63  }
  0x96   : > { %2647 = vmatmul.mubr.msk.bf16.gmra.mrb[32].mxu0 %vm994_vm0, %v2797_v62  ;;  %1696 = vperm.xlu0 %2776, %v1478_v1  }
  0x97   : > { %2650 = vmatprep.mubr.msk.bf16.mxu0 %vm994_vm0, %v2798_v0 }
  0x99   : > { %1551 = vperm.xlu1 %2777, %v1449_v2  }
  0x9a   : > { %1546 = vperm.xlu0 %2776, %v1448_v3  }
  0x9d   : > { %1631 = vperm.xlu1 %2777, %v1465_v5  }
  0x9e   : > { %2651 = vmatmul.mubr.msk.bf16.gmra.mrb[36].mxu0 %vm994_vm0, %v2799_v4  ;;  %1626 = vperm.xlu0 %2776, %v1464_v7  }
  0x9f   : > { %2654 = vmatprep.mubr.msk.bf16.mxu0 %vm994_vm0, %v2800_v6 }
  0xa1   : > { %1561 = vperm.xlu1 %2777, %v1451_v8  }
  0xa2   : > { %1556 = vperm.xlu0 %2776, %v1450_v9  }
  0xa5   : > { %1641 = vperm.xlu1 %2777, %v1467_v11  }
  0xa6   : > { %2655 = vmatmul.mubr.msk.bf16.gmra.mrb[40].mxu0 %vm994_vm0, %v2801_v10  ;;  %1636 = vperm.xlu0 %2776, %v1466_v13  }
  0xa7   : > { %2658 = vmatprep.mubr.msk.bf16.mxu0 %vm994_vm0, %v2802_v12 }
  0xa9   : > { %1711 = vperm.xlu1 %2777, %v1481_v14  }
  0xaa   : > { %1706 = vperm.xlu0 %2776, %v1480_v15  }
  0xad   : > { %1721 = vperm.xlu1 %2777, %v1483_v17  }
  0xae   : > { %2659 = vmatmul.mubr.msk.bf16.gmra.mrb[44].mxu0 %vm994_vm0, %v2803_v16  ;;  %1716 = vperm.xlu0 %2776, %v1482_v18  }
  0xd0   : > { %v3315_v25 = vpop.permute.xlu1 %1566 }
  0xd1   : > { %v1487_v24 = vpop.permute.xlu0 %1486 }
  0xd4   : > { %v3325_v29 = vpop.permute.xlu1 %1571 }
  0xd5   : > { %v3320_v27 = vpop.permute.xlu0 %1491 }
  0xd8   : > { %v3332_v32 = vpop.permute.xlu1 %1501 }
  0xd9   : > { %v3330_v31 = vpop.permute.xlu0 %1496 }
  0xdc   : > { %v3341_v35 = vpop.permute.xlu1 %1581 }
  0xdd   : > { %v3334_v33 = vpop.permute.xlu0 %1576 }
  0xe0   : > { %v3346_v37 = vpop.permute.xlu1 %1651 }
  0xe1   : > { %v3344_v36 = vpop.permute.xlu0 %1646 }
  0xe4   : > { %v3350_v39 = vpop.permute.xlu1 %1661 }
  0xe5   : > { %v3348_v38 = vpop.permute.xlu0 %1656 }
  0xe8   : > { %v3354_v41 = vpop.permute.xlu1 %1511 }
  0xe9   : > { %v3352_v40 = vpop.permute.xlu0 %1506 }
  0xec   : > { %v3359_v43 = vpop.permute.xlu1 %1591 }
  0xed   : > { %v3357_v42 = vpop.permute.xlu0 %1586 }
  0xf0   : > { %v3368_v45 = vpop.permute.xlu1 %1521 }
  0xf1   : > { %v3366_v44 = vpop.permute.xlu0 %1516 }
  0xf4   : > { %v3372_v47 = vpop.permute.xlu1 %1601 }
  0xf5   : > { %v3370_v46 = vpop.permute.xlu0 %1596 }
  0xf8   : > { %v3376_v49 = vpop.permute.xlu1 %1671 }
  0xf9   : > { %v3374_v48 = vpop.permute.xlu0 %1666  ;;  %3813 = vst [vmem:[#allocation9_spill] sm:$0xff] %v3376_v49 }
  0xfa   : > { %3812 = vst [vmem:[#allocation8_spill] sm:$0xff] %v3374_v48 }
  0xfc   : > { %v3386_v56 = vpop.permute.xlu1 %1681 }
  0xfd   : > { %v3383_v52 = vpop.permute.xlu0 %1676  ;;  %3814 = vst [vmem:[#allocation10_spill] sm:$0xff] %v3386_v56 }
 0x100   : > { %v3392_v63 = vpop.permute.xlu1 %1531 }
 0x101   : > { %v3388_v60 = vpop.permute.xlu0 %1526 }
 0x104   : > { %v3396_v4 = vpop.permute.xlu1 %1611 }
 0x105   : > { %v3394_v3 = vpop.permute.xlu0 %1606 }
 0x108   : > { %v3404_v14 = vpop.permute.xlu1 %1541 }
 0x109   : > { %v3398_v8 = vpop.permute.xlu0 %1536 }
 0x10d   : > { %v3411_v23 = vpop.permute.xlu0 %1616 }
 0x111   : > { %v3427_v56 = vpop.permute.xlu0 %1686 }
 0x129   : > { %v2616_v51 = vpop.f32.mrb[0].mxu0 }
 0x12a   : > { %v1101_v53 = vpop.f32.mrb[1].mxu0  ;;  %v1110_v9 = vadd.f32 %v2616_v51, %v3381_v50 }
 0x12b   : > { %v1102_v54 = vadd.f32 %v3381_v50, %v1101_v53  ;;  %v2617_v55 = vpop.f32.mrb[2].mxu0 }
 0x12c   : > { %v1104_v57 = vpop.f32.mrb[3].mxu0  ;;  %v1113_v10 = vadd.f32 %v2617_v55, %v3381_v50  ;;  %vm1294_vm2 = vcmp.gt.f32.partialorder %v1110_v9, 0.0  ;;  %v1342_v18 = vmul.f32 0.01, %v1110_v9 }
 0x12d   : > { %vm1292_vm1 = vcmp.gt.f32.partialorder %v1102_v54, 0.0  ;;  %v1340_v58 = vmul.f32 0.01, %v1102_v54  ;;  %v1105_v12 = vadd.f32 %v3381_v50, %v1104_v57 }
 0x12e   : > { %vm1295_vm3 = vcmp.gt.f32.partialorder %v1113_v10, 0.0  ;;  %v1343_v19 = vmul.f32 0.01, %v1113_v10  ;;  %v1390_v57 = vsel %vm1294_vm2, %v1110_v9, %v1342_v18 }
 0x12f   : > { %v1388_v59 = vsel %vm1292_vm1, %v1102_v54, %v1340_v58  ;;  %vm1293_vm4 = vcmp.gt.f32.partialorder %v1105_v12, 0.0  ;;  %v1341_v20 = vmul.f32 0.01, %v1105_v12  ;;  %v3418_v54 = vpop.permute.xlu1 %1621  ;;  %v1726_v48 = vmul.f32 %v3330_v31, %v1390_v57 }
 0x130   : > { %v3390_v61 = vmul.f32 %v1487_v24, %v1388_v59  ;;  %v1391_v58 = vsel %vm1295_vm3, %v1113_v10, %v1343_v19 }
 0x131   : > { %v2620_v62 = vpop.f32.mrb[4].mxu0  ;;  %v1389_v59 = vsel %vm1293_vm4, %v1105_v12, %v1341_v20  ;;  %v1727_v9 = vmul.f32 %v3332_v32, %v1391_v58 }
 0x132   : > { %v1117_v0 = vpop.f32.mrb[5].mxu0  ;;  %v1126_v13 = vadd.f32 %v2620_v62, %v3381_v50 }
 0x133   : > { %v2621_v1 = vpop.f32.mrb[6].mxu0  ;;  %v1118_v15 = vadd.f32 %v3381_v50, %v1117_v0 }
 0x134   : > { %v1120_v2 = vpop.f32.mrb[7].mxu0  ;;  %v1129_v16 = vadd.f32 %v2621_v1, %v3381_v50  ;;  %v1346_v21 = vmul.f32 0.01, %v1126_v13  ;;  %vm1298_vm5 = vcmp.gt.f32.partialorder %v1126_v13, 0.0 }
 0x135   : > { %v1121_v17 = vadd.f32 %v3381_v50, %v1120_v2  ;;  %v1344_v24 = vmul.f32 0.01, %v1118_v15  ;;  %vm1296_vm6 = vcmp.gt.f32.partialorder %v1118_v15, 0.0 }
 0x136   : > { %v1347_v26 = vmul.f32 0.01, %v1129_v16  ;;  %vm1299_vm7 = vcmp.gt.f32.partialorder %v1129_v16, 0.0  ;;  %v1394_v62 = vsel %vm1298_vm5, %v1126_v13, %v1346_v21 }
 0x137   : > { %v1345_v51 = vmul.f32 0.01, %v1121_v17  ;;  %vm1297_vm8 = vcmp.gt.f32.partialorder %v1121_v17, 0.0  ;;  %v1392_v0 = vsel %vm1296_vm6, %v1118_v15, %v1344_v24  ;;  %v3432_v10 = vmul.f32 %v3366_v44, %v1394_v62 }
 0x138   : > { %v1395_v1 = vsel %vm1299_vm7, %v1129_v16, %v1347_v26  ;;  %v3435_v12 = vmul.f32 %v3352_v40, %v1392_v0  ;;  %v1725_v15 = vmul.f32 %v3320_v27, %v1389_v59  ;;  %v3441_v16 = vpop.permute.xlu1 %1691  ;;  %v3454_v26 = vpop.permute.xlu0 %1696 }
 0x139   : > { %v2624_v5 = vpop.f32.mrb[8].mxu0  ;;  %v1393_v34 = vsel %vm1297_vm8, %v1121_v17, %v1345_v51  ;;  %v3438_v13 = vmul.f32 %v3368_v45, %v1395_v1 }
 0x13a   : > { %v1133_v6 = vpop.f32.mrb[9].mxu0  ;;  %v1142_v28 = vadd.f32 %v2624_v5, %v3381_v50 }
 0x13b   : > { %v2625_v7 = vpop.f32.mrb[10].mxu0  ;;  %v1134_v5 = vadd.f32 %v3381_v50, %v1133_v6 }
 0x13c   : > { %v1136_v11 = vpop.f32.mrb[11].mxu0  ;;  %v1350_v2 = vmul.f32 0.01, %v1142_v28  ;;  %vm1302_vm9 = vcmp.gt.f32.partialorder %v1142_v28, 0.0  ;;  %v1145_v49 = vadd.f32 %v2625_v7, %v3381_v50  ;;  %v3444_v7 = vmul.f32 %v3354_v41, %v1393_v34  ;;  %v3457_v62 = vpop.permute.xlu1 %1701 }
 0x13d   : > { %v1348_v17 = vmul.f32 0.01, %v1134_v5  ;;  %vm1300_vm10 = vcmp.gt.f32.partialorder %v1134_v5, 0.0  ;;  %v1137_v40 = vadd.f32 %v3381_v50, %v1136_v11 }
 0x13e   : > { %v1398_v31 = vsel %vm1302_vm9, %v1142_v28, %v1350_v2  ;;  %vm1303_vm11 = vcmp.gt.f32.partialorder %v1145_v49, 0.0  ;;  %v1351_v19 = vmul.f32 0.01, %v1145_v49 }
 0x13f   : > { %v3451_v34 = vmul.f32 %v3398_v8, %v1398_v31  ;;  %v1396_v28 = vsel %vm1300_vm10, %v1134_v5, %v1348_v17  ;;  %vm1301_vm1 = vcmp.gt.f32.partialorder %v1137_v40, 0.0  ;;  %v1349_v2 = vmul.f32 0.01, %v1137_v40 }
 0x140   : > { %v1399_v8 = vsel %vm1303_vm11, %v1145_v49, %v1351_v19 }
 0x141   : > { %v3409_v22 = vpop.f32.mrb[12].mxu0 }
 0x142   : > { %v3414_v30 = vpop.f32.mrb[13].mxu0 }
 0x143   : > { %v3416_v53 = vpop.f32.mrb[14].mxu0 }
 0x144   : > { %v3420_v55 = vpop.f32.mrb[15].mxu0 }
 0x149   : > { %v2632_v6 = vpop.f32.mrb[16].mxu0 }
 0x14a   : > { %v1174_v32 = vadd.f32 %v2632_v6, %v3381_v50  ;;  %v1165_v44 = vpop.f32.mrb[17].mxu0 }
 0x14b   : > { %v1166_v45 = vadd.f32 %v3381_v50, %v1165_v44  ;;  %v2633_v18 = vpop.f32.mrb[18].mxu0 }
 0x14c   : > { %vm1310_vm12 = vcmp.gt.f32.partialorder %v1174_v32, 0.0  ;;  %v1358_v27 = vmul.f32 0.01, %v1174_v32  ;;  %v1177_v20 = vadd.f32 %v2633_v18, %v3381_v50  ;;  %v1168_v21 = vpop.f32.mrb[19].mxu0 }
 0x14d   : > { %vm1308_vm13 = vcmp.gt.f32.partialorder %v1166_v45, 0.0  ;;  %v1356_v41 = vmul.f32 0.01, %v1166_v45  ;;  %v1169_v24 = vadd.f32 %v3381_v50, %v1168_v21 }
 0x14e   : > { %v1406_v11 = vsel %vm1310_vm12, %v1174_v32, %v1358_v27  ;;  %vm1311_vm14 = vcmp.gt.f32.partialorder %v1177_v20, 0.0  ;;  %v1359_v51 = vmul.f32 0.01, %v1177_v20 }
 0x14f   : > { %v1742_v57 = vmul.f32 %v3334_v33, %v1406_v11  ;;  %v1404_v58 = vsel %vm1308_vm13, %v1166_v45, %v1356_v41  ;;  %vm1309_vm15 = vcmp.gt.f32.partialorder %v1169_v24, 0.0  ;;  %v1357_v59 = vmul.f32 0.01, %v1169_v24  ;;  %v3487_v41 = vpop.permute.xlu1 %1551 }
 0x150   : > { %v1407_v0 = vsel %vm1311_vm14, %v1177_v20, %v1359_v51  ;;  %v1740_v1 = vmul.f32 %v3315_v25, %v1404_v58  ;;  %v3465_v33 = vmul.f32 %v3388_v60, %v1396_v28  ;;  %v3473_v25 = vmul.f32 %v3404_v14, %v1399_v8  ;;  %v3480_v60 = vpop.permute.xlu0 %1546 }
 0x151   : > { %v1743_v6 = vmul.f32 %v3341_v35, %v1407_v0  ;;  %v1405_v5 = vsel %vm1309_vm15, %v1169_v24, %v1357_v59  ;;  %v2636_v31 = vpop.f32.mrb[20].mxu0  ;;  %v3462_v17 = vadd.f32 %v1742_v57, %v1726_v48  ;;  %v1158_v35 = vadd.f32 %v3409_v22, %v3381_v50 }
 0x152   : > { %v1190_v32 = vadd.f32 %v2636_v31, %v3381_v50  ;;  %v1181_v44 = vpop.f32.mrb[21].mxu0  ;;  %v1741_v45 = vmul.f32 %v3325_v29, %v1405_v5  ;;  %v3470_v49 = vadd.f32 %v1740_v1, %v3390_v61  ;;  %v1397_v14 = vsel %vm1301_vm1, %v1137_v40, %v1349_v2 }
 0x153   : > { %v1182_v48 = vadd.f32 %v3381_v50, %v1181_v44  ;;  %v2637_v18 = vpop.f32.mrb[22].mxu0  ;;  %v3478_v19 = vadd.f32 %v1743_v6, %v1727_v9  ;;  %v3491_v9 = vadd.f32 %v3381_v50, %v3414_v30  ;;  %v3495_v40 = vmul.f32 %v3392_v63, %v1397_v14  ;;  %v3517_v44 = vpop.permute.xlu1 %1631 }
 0x154   : > { %vm1314_vm2 = vcmp.gt.f32.partialorder %v1190_v32, 0.0  ;;  %v1362_v27 = vmul.f32 0.01, %v1190_v32  ;;  %v1193_v29 = vadd.f32 %v2637_v18, %v3381_v50  ;;  %v1184_v20 = vpop.f32.mrb[23].mxu0  ;;  %v3483_v61 = vadd.f32 %v1741_v45, %v1725_v15  ;;  %v3502_v2 = vpop.permute.xlu0 %1626 }
 0x155   : > { %vm1312_vm3 = vcmp.gt.f32.partialorder %v1182_v48, 0.0  ;;  %v1360_v21 = vmul.f32 0.01, %v1182_v48  ;;  %v1185_v22 = vadd.f32 %v3381_v50, %v1184_v20  ;;  %vm1306_vm6 = vcmp.gt.f32.partialorder %v1158_v35, 0.0 }
 0x156   : > { %v1410_v24 = vsel %vm1314_vm2, %v1190_v32, %v1362_v27  ;;  %vm1315_vm4 = vcmp.gt.f32.partialorder %v1193_v29, 0.0  ;;  %v1363_v28 = vmul.f32 0.01, %v1193_v29  ;;  %v1354_v59 = vmul.f32 0.01, %v1158_v35 }
 0x157   : > { %v1746_v11 = vmul.f32 %v3370_v46, %v1410_v24  ;;  %v1408_v51 = vsel %vm1312_vm3, %v1182_v48, %v1360_v21  ;;  %vm1313_vm5 = vcmp.gt.f32.partialorder %v1185_v22, 0.0  ;;  %v1361_v15 = vmul.f32 0.01, %v1185_v22 }
 0x158   : > { %v1744_v57 = vmul.f32 %v3357_v42, %v1408_v51  ;;  %v1411_v58 = vsel %vm1315_vm4, %v1193_v29, %v1363_v28  ;;  %v1161_v46 = vadd.f32 %v3416_v53, %v3381_v50  ;;  %vm1304_vm7 = vcmp.gt.f32.partialorder %v3491_v9, 0.0  ;;  %v1557_v24 = vpop.permute.xlu0 %1556 }
 0x159   : > { %v1747_v8 = vmul.f32 %v3372_v47, %v1411_v58  ;;  %v1409_v30 = vsel %vm1313_vm5, %v1185_v22, %v1361_v15  ;;  %v2640_v0 = vpop.f32.mrb[24].mxu0  ;;  %v3500_v1 = vadd.f32 %v1746_v11, %v3432_v10  ;;  %v1352_v47 = vmul.f32 0.01, %v3491_v9  ;;  %v1562_v58 = vpop.permute.xlu1 %1561 }
 0x15a   : > { %v1745_v63 = vmul.f32 %v3359_v43, %v1409_v30  ;;  %v1206_v6 = vadd.f32 %v2640_v0, %v3381_v50  ;;  %v1197_v5 = vpop.f32.mrb[25].mxu0  ;;  %v3509_v42 = vadd.f32 %v1744_v57, %v3435_v12  ;;  %v1153_v48 = vadd.f32 %v3381_v50, %v3420_v55 }
 0x15b   : > { %v1198_v10 = vadd.f32 %v3381_v50, %v1197_v5  ;;  %v2641_v31 = vpop.f32.mrb[26].mxu0  ;;  %v3515_v32 = vadd.f32 %v1747_v8, %v3438_v13  ;;  %v1402_v13 = vsel %vm1306_vm6, %v1158_v35, %v1354_v59  ;;  %vm1307_vm12 = vcmp.gt.f32.partialorder %v1161_v46, 0.0 }
 0x15c   : > { %vm1318_vm8 = vcmp.gt.f32.partialorder %v1206_v6, 0.0  ;;  %v1366_v43 = vmul.f32 0.01, %v1206_v6  ;;  %v1209_v53 = vadd.f32 %v2641_v31, %v3381_v50  ;;  %v1200_v45 = vpop.f32.mrb[27].mxu0  ;;  %v3521_v12 = vadd.f32 %v1745_v63, %v3444_v7 }
 0x15d   : > { %vm1316_vm9 = vcmp.gt.f32.partialorder %v1198_v10, 0.0  ;;  %v1364_v18 = vmul.f32 0.01, %v1198_v10  ;;  %v1201_v27 = vadd.f32 %v3381_v50, %v1200_v45  ;;  %v1355_v7 = vmul.f32 0.01, %v1161_v46 }
 0x15e   : > { %v1414_v29 = vsel %vm1318_vm8, %v1206_v6, %v1366_v43  ;;  %vm1319_vm10 = vcmp.gt.f32.partialorder %v1209_v53, 0.0  ;;  %v1367_v20 = vmul.f32 0.01, %v1209_v53  ;;  %v1738_v11 = vmul.f32 %v1557_v24, %v1402_v13  ;;  %v1642_v13 = vpop.permute.xlu1 %1641 }
 0x15f   : > { %v1750_v14 = vmul.f32 %v3411_v23, %v1414_v29  ;;  %v1412_v21 = vsel %vm1316_vm9, %v1198_v10, %v1364_v18  ;;  %vm1317_vm11 = vcmp.gt.f32.partialorder %v1201_v27, 0.0  ;;  %v1365_v22 = vmul.f32 0.01, %v1201_v27 }
 0x160   : > { %v1748_v28 = vmul.f32 %v3394_v3, %v1412_v21  ;;  %v1415_v55 = vsel %vm1319_vm10, %v1209_v53, %v1367_v20  ;;  %v1353_v59 = vmul.f32 0.01, %v1153_v48  ;;  %v1400_v3 = vsel %vm1304_vm7, %v3491_v9, %v1352_v47  ;;  %v1637_v47 = vpop.permute.xlu0 %1636 }
 0x161   : > { %v1751_v51 = vmul.f32 %v3418_v54, %v1415_v55  ;;  %v1413_v15 = vsel %vm1317_vm11, %v1201_v27, %v1365_v22  ;;  %v2644_v57 = vpop.f32.mrb[28].mxu0  ;;  %v3531_v35 = vadd.f32 %v1750_v14, %v3451_v34  ;;  %vm1305_vm13 = vcmp.gt.f32.partialorder %v1153_v48, 0.0 }
 0x162   : > { %v1749_v23 = vmul.f32 %v3396_v4, %v1413_v15  ;;  %v1222_v8 = vadd.f32 %v2644_v57, %v3381_v50  ;;  %v1213_v30 = vpop.f32.mrb[29].mxu0  ;;  %v3536_v0 = vadd.f32 %v1748_v28, %v3465_v33  ;;  %v1403_v33 = vsel %vm1307_vm12, %v1161_v46, %v1355_v7 }
 0x163   : > { %v1214_v54 = vadd.f32 %v3381_v50, %v1213_v30  ;;  %v2645_v63 = vpop.f32.mrb[30].mxu0  ;;  %v3543_v34 = vadd.f32 %v1751_v51, %v3473_v25  ;;  %v1401_v43 = vsel %vm1305_vm13, %v1153_v48, %v1353_v59  ;;  %v1736_v29 = vmul.f32 %v3480_v60, %v1400_v3 }
 0x164   : > { %vm1322_vm14 = vcmp.gt.f32.partialorder %v1222_v8, 0.0  ;;  %v1370_v6 = vmul.f32 0.01, %v1222_v8  ;;  %v1225_v4 = vadd.f32 %v2645_v63, %v3381_v50  ;;  %v1216_v5 = vpop.f32.mrb[31].mxu0  ;;  %v3547_v10 = vadd.f32 %v1749_v23, %v3495_v40 }
 0x165   : > { %vm1320_vm15 = vcmp.gt.f32.partialorder %v1214_v54, 0.0  ;;  %v1368_v31 = vmul.f32 0.01, %v1214_v54  ;;  %v1217_v9 = vadd.f32 %v3381_v50, %v1216_v5  ;;  %v1739_v46 = vmul.f32 %v1562_v58, %v1403_v33 }
 0x166   : > { %v1418_v53 = vsel %vm1322_vm14, %v1222_v8, %v1370_v6  ;;  %vm1323_vm1 = vcmp.gt.f32.partialorder %v1225_v4, 0.0  ;;  %v1371_v25 = vmul.f32 0.01, %v1225_v4  ;;  %v1737_v48 = vmul.f32 %v3487_v41, %v1401_v43 }
 0x167   : > { %v1754_v45 = vmul.f32 %v1637_v47, %v1418_v53  ;;  %v1416_v18 = vsel %vm1320_vm15, %v1214_v54, %v1368_v31  ;;  %vm1321_vm2 = vcmp.gt.f32.partialorder %v1217_v9, 0.0  ;;  %v1369_v27 = vmul.f32 0.01, %v1217_v9 }
 0x168   : > { %v1752_v40 = vmul.f32 %v3502_v2, %v1416_v18  ;;  %v1419_v20 = vsel %vm1323_vm1, %v1225_v4, %v1371_v25 }
 0x169   : > { %v1755_v14 = vmul.f32 %v1642_v13, %v1419_v20  ;;  %v1417_v21 = vsel %vm1321_vm2, %v1217_v9, %v1369_v27  ;;  %v2648_v22 = vpop.f32.mrb[32].mxu0  ;;  %v3553_v24 = vadd.f32 %v1754_v45, %v1738_v11 }
 0x16a   : > { %v1753_v7 = vmul.f32 %v3517_v44, %v1417_v21  ;;  %v1238_v28 = vadd.f32 %v2648_v22, %v3381_v50  ;;  %v1229_v55 = vpop.f32.mrb[33].mxu0  ;;  %v3558_v51 = vadd.f32 %v1752_v40, %v1736_v29  ;;  %v3815_v21 = vld [vmem:[#allocation8_spill] sm:$0xff] }
 0x16b   : > { %v1230_v60 = vadd.f32 %v3381_v50, %v1229_v55  ;;  %v2649_v15 = vpop.f32.mrb[34].mxu0  ;;  %v3561_v2 = vadd.f32 %v1755_v14, %v1739_v46  ;;  %v2813_v14 = vld [vmem:[%s3803_s5 + $0x8] sm:$0xff]  }
 0x16c   : > { %vm1326_vm3 = vcmp.gt.f32.partialorder %v1238_v28, 0.0  ;;  %v1374_v57 = vmul.f32 0.01, %v1238_v28  ;;  %v1241_v58 = vadd.f32 %v2649_v15, %v3381_v50  ;;  %v1232_v11 = vpop.f32.mrb[35].mxu0  ;;  %v3564_v59 = vadd.f32 %v1753_v7, %v1737_v48  ;;  %v3816_v48 = vld [vmem:[#allocation10_spill] sm:$0xff]  ;;  %v3817_v15 = vld [vmem:[#allocation9_spill] sm:$0xff] }
 0x16d   : > { %vm1324_vm4 = vcmp.gt.f32.partialorder %v1230_v60, 0.0  ;;  %v1372_v41 = vmul.f32 0.01, %v1230_v60  ;;  %v1233_v44 = vadd.f32 %v3381_v50, %v1232_v11 }
 0x16e   : > { %v1422_v23 = vsel %vm1326_vm3, %v1238_v28, %v1374_v57  ;;  %vm1327_vm5 = vcmp.gt.f32.partialorder %v1241_v58, 0.0  ;;  %v1375_v8 = vmul.f32 0.01, %v1241_v58 }
 0x16f   : > { %v1758_v30 = vmul.f32 %v3348_v38, %v1422_v23  ;;  %vm1325_vm6 = vcmp.gt.f32.partialorder %v1233_v44, 0.0  ;;  %v1373_v3 = vmul.f32 0.01, %v1233_v44  ;;  %v1420_v54 = vsel %vm1324_vm4, %v1230_v60, %v1372_v41 }
 0x170   : > { %v1423_v63 = vsel %vm1327_vm5, %v1241_v58, %v1375_v8  ;;  %v1756_v6 = vmul.f32 %v3344_v36, %v1420_v54  ;;  %v3818_v58 = vld [vmem:[#allocation7_spill] sm:$0xff] }
 0x171   : > { %v1759_v4 = vmul.f32 %v3350_v39, %v1423_v63  ;;  %v2652_v5 = vpop.f32.mrb[36].mxu0  ;;  %v1421_v33 = vsel %vm1325_vm6, %v1233_v44, %v1373_v3  ;;  %v1777_v31 = vadd.f32 %v3462_v17, %v1758_v30 }
 0x172   : > { %v1254_v9 = vadd.f32 %v2652_v5, %v3381_v50  ;;  %v1245_v47 = vpop.f32.mrb[37].mxu0  ;;  %v1757_v43 = vmul.f32 %v3346_v37, %v1421_v33  ;;  %v1773_v53 = vadd.f32 %v3470_v49, %v1756_v6 }
 0x173   : > { %v1246_v38 = vadd.f32 %v3381_v50, %v1245_v47  ;;  %v2653_v25 = vpop.f32.mrb[38].mxu0  ;;  %v1779_v45 = vadd.f32 %v3478_v19, %v1759_v4  ;;  %v1707_v47 = vpop.permute.xlu0 %1706 }
 0x174   : > { %vm1330_vm7 = vcmp.gt.f32.partialorder %v1254_v9, 0.0  ;;  %v1378_v36 = vmul.f32 0.01, %v1254_v9  ;;  %v1257_v39 = vadd.f32 %v2653_v25, %v3381_v50  ;;  %v1248_v18 = vpop.f32.mrb[39].mxu0  ;;  %v1775_v27 = vadd.f32 %v3483_v61, %v1757_v43 }
 0x175   : > { %vm1328_vm8 = vcmp.gt.f32.partialorder %v1246_v38, 0.0  ;;  %v1376_v17 = vmul.f32 0.01, %v1246_v38  ;;  %v1249_v13 = vadd.f32 %v3381_v50, %v1248_v18  ;;  %v1825_v29 = vpack.c.bf16 %v1779_v45, %v1777_v31 }
 0x176   : > { %v1426_v37 = vsel %vm1330_vm7, %v1254_v9, %v1378_v36  ;;  %vm1331_vm9 = vcmp.gt.f32.partialorder %v1257_v39, 0.0  ;;  %v1379_v49 = vmul.f32 0.01, %v1257_v39  ;;  %v1824_v40 = vpack.c.bf16 %v1775_v27, %v1773_v53  ;;  %v1712_v36 = vpop.permute.xlu1 %1711 }
 0x177   : > { %v1762_v20 = vmul.f32 %v3383_v52, %v1426_v37  ;;  %v1424_v46 = vsel %vm1328_vm8, %v1246_v38, %v1376_v17  ;;  %vm1329_vm10 = vcmp.gt.f32.partialorder %v1249_v13, 0.0  ;;  %v1377_v19 = vmul.f32 0.01, %v1249_v13 }
 0x178   : > { %v1760_v61 = vmul.f32 %v3815_v21, %v1424_v46  ;;  %v1427_v22 = vsel %vm1331_vm9, %v1257_v39, %v1379_v49  ;;  %2678 = vmatprep.mubr.bf16.mxu1 %v1824_v40 }
 0x179   : > { %v1763_v7 = vmul.f32 %v3816_v48, %v1427_v22  ;;  %v1425_v28 = vsel %vm1329_vm10, %v1249_v13, %v1377_v19  ;;  %v2656_v55 = vpop.f32.mrb[40].mxu0  ;;  %2679 = vmatmul.mubr.bf16.vlgmr.msra.gmra.mrb[0].mxu1 %v1825_v29  ;;  %v1785_v60 = vadd.f32 %v3500_v1, %v1762_v20  ;;  %v1717_v20 = vpop.permute.xlu0 %1716 }
 0x17a   : > { %v1761_v52 = vmul.f32 %v3817_v15, %v1425_v28  ;;  %v1270_v57 = vadd.f32 %v2656_v55, %v3381_v50  ;;  %2695 = vmatpush3.bf16.msra.mxu1 %v3818_v58  ;;  %v1261_v11 = vpop.f32.mrb[41].mxu0  ;;  %v1781_v41 = vadd.f32 %v3509_v42, %v1760_v61  ;;  %v1722_v61 = vpop.permute.xlu1 %1721  ;;  %v2814_v58 = vld [vmem:[%s3364_s26] sm:$0xff]  }
 0x17b   : > { %v1262_v44 = vadd.f32 %v3381_v50, %v1261_v11  ;;  %v2657_v23 = vpop.f32.mrb[42].mxu0  ;;  %v1787_v8 = vadd.f32 %v3515_v32, %v1763_v7  ;;  %2696 = vmatprep.subr.bf16.mxu1 %v2813_v14  ;;  %v2815_v11 = vld [vmem:[%s3364_s26 + $0x8] sm:$0xff]  }
 0x17c   : > { %vm1334_vm11 = vcmp.gt.f32.partialorder %v1270_v57, 0.0  ;;  %v1382_v30 = vmul.f32 0.01, %v1270_v57  ;;  %v1273_v3 = vadd.f32 %v2657_v23, %v3381_v50  ;;  %v1264_v1 = vpop.f32.mrb[43].mxu0  ;;  %v1783_v54 = vadd.f32 %v3521_v12, %v1761_v52  ;;  %v3630_v23 = vld [vmem:[%s3805_s7] ss:$0 sm:$0xff] }
 0x17d   : > { %vm1332_vm12 = vcmp.gt.f32.partialorder %v1262_v44, 0.0  ;;  %v1380_v63 = vmul.f32 0.01, %v1262_v44  ;;  %v1265_v6 = vadd.f32 %v3381_v50, %v1264_v1  ;;  %v1827_v4 = vpack.c.bf16 %v1787_v8, %v1785_v60 }
 0x17e   : > { %v1430_v5 = vsel %vm1334_vm11, %v1270_v57, %v1382_v30  ;;  %vm1335_vm13 = vcmp.gt.f32.partialorder %v1273_v3, 0.0  ;;  %v1383_v42 = vmul.f32 0.01, %v1273_v3  ;;  %v1826_v33 = vpack.c.bf16 %v1783_v54, %v1781_v41  ;;  %2697 = vmatpush3.bf16.msra.mxu1 %v2813_v14  ;;  %v2820_v41 = vld [vmem:[%s3364_s26 + $0x30] sm:$0xff]  }
 0x17f   : > { %v1766_v32 = vmul.f32 %v3454_v26, %v1430_v5  ;;  %v1428_v31 = vsel %vm1332_vm12, %v1262_v44, %v1380_v63  ;;  %vm1333_vm14 = vcmp.gt.f32.partialorder %v1265_v6, 0.0  ;;  %v1381_v9 = vmul.f32 0.01, %v1265_v6  ;;  %v2821_v44 = vld [vmem:[%s3364_s26 + $0x38] sm:$0xff]  }
 0x180   : > { %v1764_v43 = vmul.f32 %v3427_v56, %v1428_v31  ;;  %v1431_v53 = vsel %vm1335_vm13, %v1273_v3, %v1383_v42  ;;  %2682 = vmatprep.mubr.bf16.mxu1 %v1826_v33 }
 0x181   : > { %v1767_v12 = vmul.f32 %v3457_v62, %v1431_v53  ;;  %v1429_v38 = vsel %vm1333_vm14, %v1265_v6, %v1381_v9  ;;  %v2660_v25 = vpop.f32.mrb[44].mxu0  ;;  %2683 = vmatmul.mubr.bf16.gmra.mrb[4].mxu1 %v1827_v4  ;;  %v1793_v45 = vadd.f32 %v3531_v35, %v1766_v32 }
 0x182   : > { %v1765_v39 = vmul.f32 %v3441_v16, %v1429_v38  ;;  %v1286_v26 = vadd.f32 %v2660_v25, %v3381_v50  ;;  %v1277_v18 = vpop.f32.mrb[45].mxu0  ;;  %v1789_v27 = vadd.f32 %v3536_v0, %v1764_v43 }
 0x183   : > { %v1278_v17 = vadd.f32 %v3381_v50, %v1277_v18  ;;  %v2661_v56 = vpop.f32.mrb[46].mxu0  ;;  %v1795_v13 = vadd.f32 %v3543_v34, %v1767_v12 }
 0x184   : > { %vm1338_vm15 = vcmp.gt.f32.partialorder %v1286_v26, 0.0  ;;  %v1386_v62 = vmul.f32 0.01, %v1286_v26  ;;  %v1289_v29 = vadd.f32 %v2661_v56, %v3381_v50  ;;  %v1280_v37 = vpop.f32.mrb[47].mxu0  ;;  %v1791_v35 = vadd.f32 %v3547_v10, %v1765_v39 }
 0x185   : > { %vm1336_vm1 = vcmp.gt.f32.partialorder %v1278_v17, 0.0  ;;  %v1384_v49 = vmul.f32 0.01, %v1278_v17  ;;  %v1281_v16 = vadd.f32 %v3381_v50, %v1280_v37  ;;  %v1829_v40 = vpack.c.bf16 %v1795_v13, %v1793_v45 }
 0x186   : > { %v1434_v46 = vsel %vm1338_vm15, %v1286_v26, %v1386_v62  ;;  %vm1339_vm2 = vcmp.gt.f32.partialorder %v1289_v29, 0.0  ;;  %v1387_v0 = vmul.f32 0.01, %v1289_v29  ;;  %v1828_v19 = vpack.c.bf16 %v1791_v35, %v1789_v27 }
 0x187   : > { %v1770_v14 = vmul.f32 %v1717_v20, %v1434_v46  ;;  %v1432_v21 = vsel %vm1336_vm1, %v1278_v17, %v1384_v49  ;;  %vm1337_vm3 = vcmp.gt.f32.partialorder %v1281_v16, 0.0  ;;  %v1385_v34 = vmul.f32 0.01, %v1281_v16 }
 0x188   : > { %v1768_v22 = vmul.f32 %v1707_v47, %v1432_v21  ;;  %v1435_v48 = vsel %vm1339_vm2, %v1289_v29, %v1387_v0  ;;  %2686 = vmatprep.mubr.bf16.mxu1 %v1828_v19 }
 0x189   : > { %v1771_v10 = vmul.f32 %v1722_v61, %v1435_v48  ;;  %v1433_v7 = vsel %vm1337_vm3, %v1281_v16, %v1385_v34  ;;  %2687 = vmatmul.mubr.bf16.gmra.mrb[8].mxu1 %v1829_v40  ;;  %v1801_v50 = vadd.f32 %v3553_v24, %v1770_v14  ;;  %v2816_v24 = vld [vmem:[%s3364_s26 + $0x10] sm:$0xff]  }
 0x18a   : > { %v1769_v28 = vmul.f32 %v1712_v36, %v1433_v7  ;;  %v1797_v55 = vadd.f32 %v3558_v51, %v1768_v22  ;;  %v2817_v51 = vld [vmem:[%s3364_s26 + $0x18] sm:$0xff]  }
 0x18b   : > { %v1803_v60 = vadd.f32 %v3561_v2, %v1771_v10  ;;  %v2818_v2 = vld [vmem:[%s3364_s26 + $0x20] sm:$0xff]  }
 0x18c   : > { %v1799_v15 = vadd.f32 %v3564_v59, %v1769_v28  ;;  %v2819_v59 = vld [vmem:[%s3364_s26 + $0x28] sm:$0xff]  }
 0x18d   : > { %v1831_v52 = vpack.c.bf16 %v1803_v60, %v1801_v50 }
 0x18e   : > { %v1830_v57 = vpack.c.bf16 %v1799_v15, %v1797_v55 }
 0x190   : > { %2690 = vmatprep.mubr.bf16.mxu1 %v1830_v57 }
 0x191   : > { %2691 = vmatmul.mubr.bf16.gmra.mrb[12].mxu1 %v1831_v52 }
 0x192   : > { %2698 = vmatprep.mubr.msk.bf16.mxu1 %vm994_vm0, %v2814_v58 }
 0x199   : > { %2699 = vmatmul.mubr.msk.bf16.vlgmr.msra.gmra.mrb[0].mxu1 %vm994_vm0, %v2815_v11 }
 0x19a   : > { %2702 = vmatprep.mubr.msk.bf16.mxu1 %vm994_vm0, %v2816_v24 }
 0x1a1   : > { %2703 = vmatmul.mubr.msk.bf16.gmra.mrb[4].mxu1 %vm994_vm0, %v2817_v51 }
 0x1a2   : > { %2706 = vmatprep.mubr.msk.bf16.mxu1 %vm994_vm0, %v2818_v2 }
 0x1a9   : > { %2707 = vmatmul.mubr.msk.bf16.gmra.mrb[8].mxu1 %vm994_vm0, %v2819_v59 }
 0x1aa   : > { %2710 = vmatprep.mubr.msk.bf16.mxu1 %vm994_vm0, %v2820_v41 }
 0x1b1   : > { %2711 = vmatmul.mubr.msk.bf16.gmra.mrb[12].mxu1 %vm994_vm0, %v2821_v44 }
 0x26c   : > { %v2700_v8 = vpop.f32.mrb[0].mxu1 }
 0x26d   : > { %v2175_v30 = vadd.f32 %v2700_v8, %v3630_v23  ;;  %v2103_v3 = vpop.f32.mrb[1].mxu1 }
 0x26e   : > { %v2173_v1 = vadd.f32 %v3630_v23, %v2103_v3  ;;  %v2701_v54 = vpop.f32.mrb[2].mxu1 }
 0x26f   : > { %v2207_v63 = vmul.f32 0.01, %v2175_v30  ;;  %v2176_v6 = vadd.f32 %v2701_v54, %v3630_v23  ;;  %v2106_v4 = vpop.f32.mrb[3].mxu1  ;;  %vm2191_vm4 = vcmp.gt.f32.partialorder %v2175_v30, 0.0 }
 0x270   : > { %v2205_v5 = vmul.f32 0.01, %v2173_v1  ;;  %v2174_v42 = vadd.f32 %v3630_v23, %v2106_v4  ;;  %vm2189_vm0 = vcmp.gt.f32.partialorder %v2173_v1, 0.0 }
 0x271   : > { %v3636_v33 = vsel %vm2191_vm4, %v2175_v30, %v2207_v63  ;;  %v2208_v9 = vmul.f32 0.01, %v2176_v6  ;;  %vm2192_vm6 = vcmp.gt.f32.partialorder %v2176_v6, 0.0 }
 0x272   : > { %v2206_v32 = vmul.f32 0.01, %v2174_v42  ;;  %v2239_v31 = vmul.f32 %v3636_v33, %v3636_v33  ;;  %vm2190_vm5 = vcmp.gt.f32.partialorder %v2174_v42, 0.0  ;;  %v3640_v47 = vsel %vm2189_vm0, %v2173_v1, %v2205_v5 }
 0x273   : > { %v2237_v39 = vmul.f32 %v3640_v47, %v3640_v47  ;;  %v3651_v17 = vsel %vm2192_vm6, %v2176_v6, %v2208_v9 }
 0x274   : > { %2257 = vadd.xlane.f32.xlu0 %v2239_v31  ;;  %v2704_v43 = vpop.f32.mrb[4].mxu1  ;;  %v3642_v53 = vsel %vm2190_vm5, %v2174_v42, %v2206_v32  ;;  %v2240_v37 = vmul.f32 %v3651_v17, %v3651_v17 }
 0x275   : > { %v2179_v12 = vadd.f32 %v2704_v43, %v3630_v23  ;;  %v2119_v38 = vpop.f32.mrb[5].mxu1  ;;  %v2238_v25 = vmul.f32 %v3642_v53, %v3642_v53 }
 0x276   : > { %v2177_v45 = vadd.f32 %v3630_v23, %v2119_v38  ;;  %v2705_v36 = vpop.f32.mrb[6].mxu1 }
 0x277   : > { %v2211_v26 = vmul.f32 0.01, %v2179_v12  ;;  %v2180_v18 = vadd.f32 %v2705_v36, %v3630_v23  ;;  %2255 = vadd.xlane.f32.xlu1 %v2238_v25  ;;  %v2122_v27 = vpop.f32.mrb[7].mxu1  ;;  %vm2195_vm7 = vcmp.gt.f32.partialorder %v2179_v12, 0.0 }
 0x278   : > { %v2209_v56 = vmul.f32 0.01, %v2177_v45  ;;  %v2178_v13 = vadd.f32 %v3630_v23, %v2122_v27  ;;  %2253 = vadd.xlane.f32.xlu0 %v2237_v39  ;;  %vm2193_vm8 = vcmp.gt.f32.partialorder %v2177_v45, 0.0 }
 0x279   : > { %v2212_v62 = vmul.f32 0.01, %v2180_v18  ;;  %v3654_v29 = vsel %vm2195_vm7, %v2179_v12, %v2211_v26  ;;  %vm2196_vm9 = vcmp.gt.f32.partialorder %v2180_v18, 0.0 }
 0x27a   : > { %v2243_v35 = vmul.f32 %v3654_v29, %v3654_v29  ;;  %v2210_v49 = vmul.f32 0.01, %v2178_v13  ;;  %v3660_v16 = vsel %vm2193_vm8, %v2177_v45, %v2209_v56  ;;  %vm2194_vm10 = vcmp.gt.f32.partialorder %v2178_v13, 0.0 }
 0x27b   : > { %v3662_v40 = vsel %vm2196_vm9, %v2180_v18, %v2212_v62  ;;  %v2241_v21 = vmul.f32 %v3660_v16, %v3660_v16 }
 0x27c   : > { %2259 = vadd.xlane.f32.xlu0 %v2240_v37  ;;  %2265 = vadd.xlane.f32.xlu1 %v2243_v35  ;;  %v2708_v20 = vpop.f32.mrb[8].mxu1  ;;  %v2244_v34 = vmul.f32 %v3662_v40, %v3662_v40  ;;  %v3671_v10 = vsel %vm2194_vm10, %v2178_v13, %v2210_v49 }
 0x27d   : > { %v2183_v46 = vadd.f32 %v2708_v20, %v3630_v23  ;;  %v2135_v0 = vpop.f32.mrb[9].mxu1  ;;  %v2242_v60 = vmul.f32 %v3671_v10, %v3671_v10 }
 0x27e   : > { %v2181_v19 = vadd.f32 %v3630_v23, %v2135_v0  ;;  %v2709_v14 = vpop.f32.mrb[10].mxu1 }
 0x27f   : > { %v2215_v61 = vmul.f32 0.01, %v2183_v46  ;;  %v2184_v22 = vadd.f32 %v2709_v14, %v3630_v23  ;;  %v2138_v48 = vpop.f32.mrb[11].mxu1  ;;  %vm2199_vm11 = vcmp.gt.f32.partialorder %v2183_v46, 0.0 }
 0x280   : > { %v2213_v7 = vmul.f32 0.01, %v2181_v19  ;;  %v2182_v50 = vadd.f32 %v3630_v23, %v2138_v48  ;;  %2261 = vadd.xlane.f32.xlu1 %v2241_v21  ;;  %2267 = vadd.xlane.f32.xlu0 %v2244_v34  ;;  %vm2197_vm12 = vcmp.gt.f32.partialorder %v2181_v19, 0.0 }
 0x281   : > { %v2216_v28 = vmul.f32 0.01, %v2184_v22  ;;  %v3674_v55 = vsel %vm2199_vm11, %v2183_v46, %v2215_v61  ;;  %vm2200_vm13 = vcmp.gt.f32.partialorder %v2184_v22, 0.0 }
 0x282   : > { %v2247_v15 = vmul.f32 %v3674_v55, %v3674_v55  ;;  %v2214_v52 = vmul.f32 0.01, %v2182_v50  ;;  %v3680_v57 = vsel %vm2197_vm12, %v2181_v19, %v2213_v7  ;;  %vm2198_vm14 = vcmp.gt.f32.partialorder %v2182_v50, 0.0 }
 0x283   : > { %v3682_v58 = vsel %vm2200_vm13, %v2184_v22, %v2216_v28  ;;  %v2245_v41 = vmul.f32 %v3680_v57, %v3680_v57 }
 0x284   : > { %2263 = vadd.xlane.f32.xlu0 %v2242_v60  ;;  %2273 = vadd.xlane.f32.xlu1 %v2247_v15  ;;  %v2712_v11 = vpop.f32.mrb[12].mxu1  ;;  %v2248_v44 = vmul.f32 %v3682_v58, %v3682_v58  ;;  %v3691_v3 = vsel %vm2198_vm14, %v2182_v50, %v2214_v52 }
 0x285   : > { %v2187_v24 = vadd.f32 %v2712_v11, %v3630_v23  ;;  %v2151_v51 = vpop.f32.mrb[13].mxu1  ;;  %v2246_v4 = vmul.f32 %v3691_v3, %v3691_v3 }
 0x286   : > { %v2185_v2 = vadd.f32 %v3630_v23, %v2151_v51  ;;  %v2713_v59 = vpop.f32.mrb[14].mxu1 }
 0x287   : > { %v2188_v8 = vadd.f32 %v2713_v59, %v3630_v23  ;;  %v2154_v30 = vpop.f32.mrb[15].mxu1  ;;  %v2219_v1 = vmul.f32 0.01, %v2187_v24  ;;  %vm2203_vm1 = vcmp.gt.f32.partialorder %v2187_v24, 0.0 }
 0x288   : > { %v2217_v54 = vmul.f32 0.01, %v2185_v2  ;;  %v2186_v63 = vadd.f32 %v3630_v23, %v2154_v30  ;;  %2269 = vadd.xlane.f32.xlu1 %v2245_v41  ;;  %2275 = vadd.xlane.f32.xlu0 %v2248_v44  ;;  %vm2201_vm15 = vcmp.gt.f32.partialorder %v2185_v2, 0.0 }
 0x289   : > { %v2220_v42 = vmul.f32 0.01, %v2188_v8  ;;  %v3702_v9 = vsel %vm2203_vm1, %v2187_v24, %v2219_v1  ;;  %vm2204_vm3 = vcmp.gt.f32.partialorder %v2188_v8, 0.0 }
 0x28a   : > { %v2218_v6 = vmul.f32 0.01, %v2186_v63  ;;  %v3696_v5 = vsel %vm2201_vm15, %v2185_v2, %v2217_v54  ;;  %vm2202_vm2 = vcmp.gt.f32.partialorder %v2186_v63, 0.0  ;;  %v2251_v43 = vmul.f32 %v3702_v9, %v3702_v9 }
 0x28b   : > { %v2249_v32 = vmul.f32 %v3696_v5, %v3696_v5  ;;  %v3708_v12 = vsel %vm2204_vm3, %v2188_v8, %v2220_v42 }
 0x28c   : > { %2271 = vadd.xlane.f32.xlu0 %v2246_v4  ;;  %v3700_v31 = vsel %vm2202_vm2, %v2186_v63, %v2218_v6  ;;  %v2252_v38 = vmul.f32 %v3708_v12, %v3708_v12 }
 0x28d   : > { %2277 = vadd.xlane.f32.xlu1 %v2249_v32  ;;  %v2250_v23 = vmul.f32 %v3700_v31, %v3700_v31 }
 0x290   : > { %2279 = vadd.xlane.f32.xlu0 %v2250_v23 }
 0x291   : > { %2281 = vadd.xlane.f32.xlu1 %v2251_v43 }
 0x294   : > { %2283 = vadd.xlane.f32.xlu0 %v2252_v38 }
 0x301   : > { %v2258_v25 = vpop.xlane.xlu0 %2257 }
 0x302   : > { %v2287_v45 = vadd.f32 1e-12, %v2258_v25 }
 0x304   : > { %2822 = vrsqrt.f32 %v2287_v45  ;;  %v2256_v36 = vpop.xlane.xlu1 %2255 }
 0x305   : > { %v2286_v39 = vadd.f32 1e-12, %v2256_v36  ;;  %v2254_v26 = vpop.xlane.xlu0 %2253 }
 0x306   : > { %v2285_v18 = vadd.f32 1e-12, %v2254_v26 }
 0x307   : > { %2824 = vrsqrt.f32 %v2286_v39 }
 0x308   : > { %2826 = vrsqrt.f32 %v2285_v18 }
 0x309   : > { %v2260_v27 = vpop.xlane.xlu0 %2259  ;;  %v2266_v56 = vpop.xlane.xlu1 %2265 }
 0x30a   : > { %v2288_v13 = vadd.f32 1e-12, %v2260_v27  ;;  %v2291_v62 = vadd.f32 1e-12, %v2266_v56 }
 0x30c   : > { %2828 = vrsqrt.f32 %v2288_v13 }
 0x30d   : > { %2830 = vrsqrt.f32 %v2291_v62  ;;  %v2262_v37 = vpop.xlane.xlu1 %2261  ;;  %v2268_v35 = vpop.xlane.xlu0 %2267 }
 0x30e   : > { %v2823_v49 = vpop.eup %2822  ;;  %v2289_v20 = vadd.f32 1e-12, %v2262_v37  ;;  %v2292_v46 = vadd.f32 1e-12, %v2268_v35 }
 0x30f   : > { %v2319_v0 = vmul.f32 %v2823_v49, %v3636_v33 }
 0x310   : > { %2832 = vrsqrt.f32 %v2289_v20 }
 0x311   : > { %v2825_v19 = vpop.eup %2824  ;;  %2335 = vst [vmem:[%s3714_s21 + $0x10] sm:$0xff] %v2319_v0  ;;  %2834 = vrsqrt.f32 %v2292_v46  ;;  %v2264_v14 = vpop.xlane.xlu0 %2263 }
 0x312   : > { %v2274_v21 = vpop.xlane.xlu1 %2273  ;;  %v2827_v34 = vpop.eup %2826  ;;  %v2318_v61 = vmul.f32 %v2825_v19, %v3642_v53  ;;  %v2290_v22 = vadd.f32 1e-12, %v2264_v14 }
 0x313   : > { %v2295_v48 = vadd.f32 1e-12, %v2274_v21  ;;  %v2317_v7 = vmul.f32 %v2827_v34, %v3640_v47 }
 0x314   : > { %2334 = vst [vmem:[%s3714_s21 + $0x8] sm:$0xff] %v2318_v61  ;;  %2836 = vrsqrt.f32 %v2290_v22 }
 0x315   : > { %2333 = vst [vmem:[%s3714_s21] sm:$0xff] %v2317_v7  ;;  %2838 = vrsqrt.f32 %v2295_v48  ;;  %v2276_v50 = vpop.xlane.xlu0 %2275 }
 0x316   : > { %v2270_v33 = vpop.xlane.xlu1 %2269  ;;  %v2829_v28 = vpop.eup %2828  ;;  %v2296_v15 = vadd.f32 1e-12, %v2276_v50 }
 0x317   : > { %v2293_v60 = vadd.f32 1e-12, %v2270_v33  ;;  %v2831_v52 = vpop.eup %2830  ;;  %v2320_v11 = vmul.f32 %v2829_v28, %v3651_v17 }
 0x318   : > { %v2323_v53 = vmul.f32 %v2831_v52, %v3654_v29 }
 0x319   : > { %2840 = vrsqrt.f32 %v2293_v60  ;;  %2336 = vst [vmem:[%s3714_s21 + $0x18] sm:$0xff] %v2320_v11  ;;  %v2272_v47 = vpop.xlane.xlu0 %2271 }
 0x31a   : > { %2842 = vrsqrt.f32 %v2296_v15  ;;  %v2833_v24 = vpop.eup %2832  ;;  %2339 = vst [vmem:[%s3714_s21 + $0x30] sm:$0xff] %v2323_v53  ;;  %v2294_v51 = vadd.f32 1e-12, %v2272_v47  ;;  %v2278_v2 = vpop.xlane.xlu1 %2277 }
 0x31b   : > { %v2835_v59 = vpop.eup %2834  ;;  %v2321_v41 = vmul.f32 %v2833_v24, %v3660_v16  ;;  %v2297_v44 = vadd.f32 1e-12, %v2278_v2 }
 0x31c   : > { %v2324_v8 = vmul.f32 %v2835_v59, %v3662_v40  ;;  %2844 = vrsqrt.f32 %v2294_v51 }
 0x31d   : > { %2337 = vst [vmem:[%s3714_s21 + $0x20] sm:$0xff] %v2321_v41  ;;  %2846 = vrsqrt.f32 %v2297_v44  ;;  %v2280_v17 = vpop.xlane.xlu0 %2279 }
 0x31e   : > { %v2837_v29 = vpop.eup %2836  ;;  %2340 = vst [vmem:[%s3714_s21 + $0x38] sm:$0xff] %v2324_v8  ;;  %v2298_v30 = vadd.f32 1e-12, %v2280_v17  ;;  %v2282_v1 = vpop.xlane.xlu1 %2281 }
 0x31f   : > { %v2839_v54 = vpop.eup %2838  ;;  %v2322_v63 = vmul.f32 %v2837_v29, %v3671_v10  ;;  %v2299_v6 = vadd.f32 1e-12, %v2282_v1 }
 0x320   : > { %v2327_v16 = vmul.f32 %v2839_v54, %v3674_v55  ;;  %2848 = vrsqrt.f32 %v2298_v30 }
 0x321   : > { %2338 = vst [vmem:[%s3714_s21 + $0x28] sm:$0xff] %v2322_v63  ;;  %2850 = vrsqrt.f32 %v2299_v6  ;;  %v2284_v40 = vpop.xlane.xlu0 %2283 }
 0x322   : > { %2343 = vst [vmem:[%s3714_s21 + $0x50] sm:$0xff] %v2327_v16  ;;  %v2300_v42 = vadd.f32 1e-12, %v2284_v40 }
 0x323   : > { %v2841_v4 = vpop.eup %2840 }
 0x324   : > { %v2843_v32 = vpop.eup %2842  ;;  %v2325_v23 = vmul.f32 %v2841_v4, %v3680_v57  ;;  %2852 = vrsqrt.f32 %v2300_v42 }
 0x325   : > { %v2328_v10 = vmul.f32 %v2843_v32, %v3682_v58 }
 0x326   : > { %2341 = vst [vmem:[%s3714_s21 + $0x40] sm:$0xff] %v2325_v23  ;;  %v2845_v55 = vpop.eup %2844 }
 0x327   : > { %2344 = vst [vmem:[%s3714_s21 + $0x58] sm:$0xff] %v2328_v10  ;;  %v2847_v43 = vpop.eup %2846  ;;  %v2326_v38 = vmul.f32 %v2845_v55, %v3691_v3 }
 0x328   : > { %v2329_v25 = vmul.f32 %v2847_v43, %v3696_v5 }
 0x329   : > { %2342 = vst [vmem:[%s3714_s21 + $0x48] sm:$0xff] %v2326_v38 }
 0x32a   : > { %v2849_v45 = vpop.eup %2848  ;;  %2345 = vst [vmem:[%s3714_s21 + $0x60] sm:$0xff] %v2329_v25 }
 0x32b   : > { %v2851_v57 = vpop.eup %2850  ;;  %v2330_v58 = vmul.f32 %v2849_v45, %v3700_v31 }
 0x32c   : > { %v2331_v36 = vmul.f32 %v2851_v57, %v3702_v9 }
 0x32d   : > { %2346 = vst [vmem:[%s3714_s21 + $0x68] sm:$0xff] %v2330_v58 }
 0x32e   : > { %v2853_v39 = vpop.eup %2852  ;;  %2347 = vst [vmem:[%s3714_s21 + $0x70] sm:$0xff] %v2331_v36 }
 0x32f   : > { %v2332_v3 = vmul.f32 %v2853_v39, %v3708_v12 }
 0x331   : > { %2348 = vst [vmem:[%s3714_s21 + $0x78] sm:$0xff] %v2332_v3 }
 0x332   : > { %2867 = shalt.err (!%p2864_p7)
}
 0x333   : > { %s2868_s19 = scalar_lea.hbm %s3750_s10, 2048  ;;  %s2872_s22 = scalar_lea.hbm %s3806_s8, 4096 }
 0x334   : > { %p2869_p10 = scmp.ne.s32.totalorder %s3750_s10, %s2868_s19  ;;  %p2873_p13 = scmp.lt.u32.totalorder %s3750_s10, %s3806_s8 }
 0x335   : > { %p2874_p0 = scmp.lt.u32.totalorder %s2872_s22, %s2868_s19  ;;  %p2876_p2 = scmp.lt.u32.totalorder %s2868_s19, %s3750_s10 }
 0x336   : > { %p2870_p11 = pnand %p2869_p10, %p3010_p6 }
 0x337   : > { %p2875_p1 = por %p2874_p0, %p2873_p13 }
 0x338   : > { %p2871_p12 = pneg %p2870_p11 }
 0x339   : > { %p2877_p3 = por %p2876_p2, %p2875_p1 }
 0x33b   : > { %p2878_p4 = pnand %p2877_p3, %p2871_p12 }
 0x33d   : > { %2881 = shalt.err (!%p2878_p4)
}
 0x33e   : > { %s2920_s12 = smov 128   ;;  %s2921_s13 = smov 8  }
 0x33f   : > { %2734 = dma.vmem_to_hbm [thread:$0]  (%p3010_p6), %s3752_s24, 2048, %s3750_s10, %s2350_s9, %s2920_s12, %s2920_s12, %s2921_s13  }
 0x340 PF: > { %s2378_s18 = sand.u32 1, %s2904_s27   ;;  %p2737_p5 = pnand %p2463_p9, %p3014_p8 }
 0x341   : > { %s2379_s15 = scalar_lea.sflag [#allocation5], %s2378_s18 }
 0x342   : > { %2899 = dma.done.wait (!%p2737_p5), %s2379_s15, 2048  }
 0x343   : > { %2901 = vsyncadd (!%p2737_p5), %s2379_s15, 4294965248  ;;  %p18_p7 = scmp.ge.s32.totalorder %s2992_s11, 4   ;;  %s3819_s27 = smov %s2908_s28 }
 0x344   : > { %s3820_s28 = smov %s2912_s29  ;;  %s3821_s29 = smov %s3004_s14 }
 0x345   : > { %s3822_s30 = smov %s2992_s11  ;;  %20 = sbr.rel (!%p18_p7) target bundleno = 3 (0x3), region = 182 }
 0x34c   :  { %2384 = vsyncpa [#allocation5], 1 }
 0x34d   :  { %2386 = vsyncpa [#allocation5 + $0x1], 1 }

</bundles_post_ra>
